<compile_context>
chip_gen: v7x
topology: tpu7x:2x2x1
jax: 0.10.0
libtpu: 0.0.40
codegen_flags: <defaults>
</compile_context>

<pallas_src>
import functools

import jax
import jax.numpy as jnp
from jax.experimental import pallas as pl
from jax.experimental.pallas import tpu as pltpu


# ---------------------------------------------------------------------------
# BlockSpec helper: whole array as a single block (demo-sized shapes).
# ---------------------------------------------------------------------------
def _full_spec(shape):
    return pl.BlockSpec(shape, lambda i: tuple(0 for _ in shape))


# ---------------------------------------------------------------------------
# Fused kernel: entire SDCN forward in one pallas_call (demo sizes).
# ---------------------------------------------------------------------------
def _sdcn_fused_kernel(
    x_ref, adj_ref,
    e1w_ref, e1b_ref, e2w_ref, e2b_ref, e3w_ref, e3b_ref, zw_ref, zb_ref,
    d1w_ref, d1b_ref, d2w_ref, d2b_ref, d3w_ref, d3b_ref, xbw_ref, xbb_ref,
    g1w_ref, g2w_ref, g3w_ref, g4w_ref, g5w_ref,
    ct_ref,
    out_ref,
    *, v, slab,
):
    f32 = jnp.float32
    x = x_ref[...]
    adj = adj_ref[...]          # loaded into VMEM once, reused by all 5 GNN layers

    def lin(a, w_ref, b_ref, relu):
        y = jnp.dot(a, w_ref[...], preferred_element_type=f32) + b_ref[...]
        return jnp.maximum(y, 0.0) if relu else y

    # ---- auto-encoder ----
    e1 = lin(x, e1w_ref, e1b_ref, True)
    e2 = lin(e1, e2w_ref, e2b_ref, True)
    e3 = lin(e2, e3w_ref, e3b_ref, True)
    z = lin(e3, zw_ref, zb_ref, False)
    d1 = lin(z, d1w_ref, d1b_ref, True)
    d2 = lin(d1, d2w_ref, d2b_ref, True)
    d3 = lin(d2, d3w_ref, d3b_ref, True)
    x_bar = lin(d3, xbw_ref, xbb_ref, False)

    # ---- GCN branch with AE feature injection (sigma = 0.5 mix) ----
    def gnn(feats, w_ref, relu):
        support = jnp.dot(feats, w_ref[...], preferred_element_type=f32)
        out = jnp.dot(adj, support, preferred_element_type=f32)
        return jnp.maximum(out, 0.0) if relu else out

    # sigma = 0.5:  (1-sigma)*h + sigma*e  ==  0.5 * (h + e)   (1 vmul + 1 vadd)
    h = gnn(x, g1w_ref, True)
    h = gnn(0.5 * (h + e1), g2w_ref, True)
    h = gnn(0.5 * (h + e2), g3w_ref, True)
    h = gnn(0.5 * (h + e3), g4w_ref, True)
    h = gnn(0.5 * (h + z), g5w_ref, False)

    # ---- predict = row softmax(h); divide → EUP reciprocal ----
    m = jnp.max(h, axis=1, keepdims=True)
    eh = jnp.exp(h - m)
    predict = eh * pl.reciprocal(jnp.sum(eh, axis=1, keepdims=True), approx=True)

    # ---- student-t cluster assignment q ----
    ct = ct_ref[...]                                      # (n_z, K) = centers^T
    z2 = jnp.sum(z * z, axis=1, keepdims=True)            # (N, 1)
    c2 = jnp.sum(ct * ct, axis=0, keepdims=True)          # (1, K)
    zc = jnp.dot(z, ct, preferred_element_type=f32)       # (N, K)
    dist2 = jnp.maximum(z2 + c2 - 2.0 * zc, 0.0)          # clamp: cancellation guard
    q = pl.reciprocal(1.0 + dist2 * (1.0 / v), approx=True)
    power = (v + 1.0) / 2.0
    if power != 1.0:             # static guard: pow is a no-op when v == 1
        q = q ** power
    q = q * pl.reciprocal(jnp.sum(q, axis=1, keepdims=True), approx=True)

    # ---- pack all outputs and write ONE unmasked lane-dense slab ----
    pieces = [x_bar, z, h, predict, q]
    used = sum(a.shape[1] for a in pieces)
    if slab > used:
        pieces.append(jnp.zeros((x.shape[0], slab - used), f32))
    out_ref[...] = jnp.concatenate(pieces, axis=1)


# ---------------------------------------------------------------------------
# SDCN forward wrapper (single pallas_call + cheap output slicing)
# ---------------------------------------------------------------------------
def sdcn_forward(x, adj, p, v=1.0):
    N, n_input = x.shape
    n_z = p["z_w"].shape[1]
    k = p["g5_w"].shape[1]
    used = n_input + n_z + 3 * k
    slab = max(128, ((used + 127) // 128) * 128)   # lane-dense HBM output width

    arrays = [
        x, adj,
        p["enc1_w"], p["enc1_b"], p["enc2_w"], p["enc2_b"],
        p["enc3_w"], p["enc3_b"], p["z_w"], p["z_b"],
        p["dec1_w"], p["dec1_b"], p["dec2_w"], p["dec2_b"],
        p["dec3_w"], p["dec3_b"], p["xbar_w"], p["xbar_b"],
        p["g1_w"], p["g2_w"], p["g3_w"], p["g4_w"], p["g5_w"],
        p["cluster_t"],
    ]

    # ---- advisory cost estimate for XLA scheduling ----
    ae_keys = ["enc1_w", "enc2_w", "enc3_w", "z_w",
               "dec1_w", "dec2_w", "dec3_w", "xbar_w"]
    gnn_keys = ["g1_w", "g2_w", "g3_w", "g4_w", "g5_w"]
    flops = sum(2 * N * p[key].shape[0] * p[key].shape[1] for key in ae_keys + gnn_keys)
    flops += sum(2 * N * N * p[key].shape[1] for key in gnn_keys)   # adj @ support
    flops += 2 * N * n_z * k                                        # z @ centers^T
    bytes_accessed = sum(int(a.size) * a.dtype.itemsize for a in arrays) + N * slab * 4
    cost = pl.CostEstimate(flops=int(flops), transcendentals=int(N * k),
                           bytes_accessed=int(bytes_accessed))

    kern = functools.partial(_sdcn_fused_kernel, v=float(v), slab=slab)

    out = pl.pallas_call(
        kern,
        out_shape=jax.ShapeDtypeStruct((N, slab), jnp.float32),
        grid=(1,),
        in_specs=[_full_spec(a.shape) for a in arrays],
        out_specs=_full_spec((N, slab)),
        compiler_params=pltpu.CompilerParams(
            dimension_semantics=("arbitrary",)),
        cost_estimate=cost,
    )(*arrays)

    col = 0
    x_bar = out[:, col:col + n_input]; col += n_input
    z = out[:, col:col + n_z]; col += n_z
    h = out[:, col:col + k]; col += k
    predict = out[:, col:col + k]; col += k
    q = out[:, col:col + k]; col += k
    return x_bar, q, predict, z, h


# ---------------------------------------------------------------------------
# Production-size GNN layer:  relu_maybe( adj @ (feats @ W) )
#   adj streamed in (TM, TK) bf16 tiles, support resident in VMEM, f32 acc.
# ---------------------------------------------------------------------------
def _support_kernel(feats_ref, w_ref, out_ref):
    out_ref[...] = jnp.dot(feats_ref[...], w_ref[...],
                           preferred_element_type=jnp.float32).astype(out_ref.dtype)


def _gnn_tiled_kernel(adj_ref, sup_ref, out_ref, acc_ref, *, relu):
    k = pl.program_id(1)

    @pl.when(k == 0)
    def _():
        acc_ref[...] = jnp.zeros_like(acc_ref)

    tk = adj_ref.shape[1]
    off = pl.multiple_of(k * tk, tk)
    sup = sup_ref[pl.ds(off, tk), :]                 # resident support slice
    acc_ref[...] += jnp.dot(adj_ref[...], sup, preferred_element_type=jnp.float32)

    @pl.when(k == pl.num_programs(1) - 1)
    def _():
        r = acc_ref[...]
        if relu:
            r = jnp.maximum(r, 0.0)
        out_ref[...] = r.astype(out_ref.dtype)


def gnn_layer_tiled(feats, w, adj, *, relu=True, operand_dtype=jnp.bfloat16,
                    tm=128, tk=128):
    """Tiled GNN layer for production N.  N must be a multiple of tm and tk."""
    N = adj.shape[0]
    fout = w.shape[1]

    # support = feats @ W  (small: N x Fout), cast to the MXU operand dtype.
    support = pl.pallas_call(
        _support_kernel,
        out_shape=jax.ShapeDtypeStruct((N, fout), operand_dtype),
        grid=(1,),
        in_specs=[_full_spec(feats.shape), _full_spec(w.shape)],
        out_specs=_full_spec((N, fout)),
    )(feats, w)

    adj_c = adj.astype(operand_dtype)                # halve the dominant HBM stream
    itemsize = jnp.dtype(operand_dtype).itemsize

    # VMEM budget: 2 adj buffers + resident support + accumulator + 2 out buffers.
    est = (2 * tm * tk * itemsize + 2 * N * fout * itemsize
           + tm * fout * 4 + 2 * tm * fout * 4)
    vmem_limit = int(min(max(4 * est, 16 * 1024 * 1024), 48 * 1024 * 1024))

    cost = pl.CostEstimate(
        flops=int(2 * N * N * fout), transcendentals=0,
        bytes_accessed=int(N * N * itemsize + N * fout * itemsize + N * fout * 4))

    return pl.pallas_call(
        functools.partial(_gnn_tiled_kernel, relu=relu),
        out_shape=jax.ShapeDtypeStruct((N, fout), jnp.float32),
        grid_spec=pltpu.PrefetchScalarGridSpec(
            num_scalar_prefetch=0,
            grid=(N // tm, N // tk),                       # reduction axis LAST
            in_specs=[pl.BlockSpec((tm, tk), lambda i, k: (i, k)),
                      pl.BlockSpec((N, fout), lambda i, k: (0, 0))],  # resident
            out_specs=pl.BlockSpec((tm, fout), lambda i, k: (i, 0)),
            scratch_shapes=[pltpu.VMEM((tm, fout), jnp.float32)]),
        compiler_params=pltpu.CompilerParams(
            dimension_semantics=("parallel", "arbitrary"),  # row axis → 2 TCs on v7x
            vmem_limit_bytes=vmem_limit),
        cost_estimate=cost,
    )(adj_c, support)


# ---------------------------------------------------------------------------
# Pure-JAX reference for verification
# ---------------------------------------------------------------------------
def sdcn_reference(x, adj, p, v=1.0):
    relu = jax.nn.relu
    e1 = relu(x @ p["enc1_w"] + p["enc1_b"])
    e2 = relu(e1 @ p["enc2_w"] + p["enc2_b"])
    e3 = relu(e2 @ p["enc3_w"] + p["enc3_b"])
    z = e3 @ p["z_w"] + p["z_b"]
    d1 = relu(z @ p["dec1_w"] + p["dec1_b"])
    d2 = relu(d1 @ p["dec2_w"] + p["dec2_b"])
    d3 = relu(d2 @ p["dec3_w"] + p["dec3_b"])
    x_bar = d3 @ p["xbar_w"] + p["xbar_b"]

    sigma = 0.5
    h = relu(adj @ (x @ p["g1_w"]))
    h = relu(adj @ (((1 - sigma) * h + sigma * e1) @ p["g2_w"]))
    h = relu(adj @ (((1 - sigma) * h + sigma * e2) @ p["g3_w"]))
    h = relu(adj @ (((1 - sigma) * h + sigma * e3) @ p["g4_w"]))
    h = adj @ (((1 - sigma) * h + sigma * z) @ p["g5_w"])
    predict = jax.nn.softmax(h, axis=1)

    cluster = p["cluster_t"].T  # (n_clusters, n_z)
    q = 1.0 / (1.0 + jnp.sum((z[:, None, :] - cluster[None, :, :]) ** 2, 2) / v)
    q = q ** ((v + 1.0) / 2.0)
    q = q / jnp.sum(q, axis=1, keepdims=True)
    return x_bar, q, predict, z, h


# ---------------------------------------------------------------------------
if __name__ == "__main__":
    key = jax.random.PRNGKey(0)

    # small shapes consistent with SDCN(n_enc_*, n_dec_*, n_input, n_z, n_clusters)
    N = 16               # number of graph nodes
    n_input = 32
    n_enc_1, n_enc_2, n_enc_3 = 64, 64, 32
    n_dec_1, n_dec_2, n_dec_3 = 32, 64, 64
    n_z = 16
    n_clusters = 4
    v = 1.0

    def xavier(k, shape):
        fan_in, fan_out = shape
        std = (2.0 / (fan_in + fan_out)) ** 0.5
        return std * jax.random.normal(k, shape, dtype=jnp.float32)

    ks = iter(jax.random.split(key, 32))

    p = {
        # AE encoder / decoder linears: W is (in, out), b is (1, out)
        "enc1_w": xavier(next(ks), (n_input, n_enc_1)), "enc1_b": jnp.zeros((1, n_enc_1), jnp.float32),
        "enc2_w": xavier(next(ks), (n_enc_1, n_enc_2)), "enc2_b": jnp.zeros((1, n_enc_2), jnp.float32),
        "enc3_w": xavier(next(ks), (n_enc_2, n_enc_3)), "enc3_b": jnp.zeros((1, n_enc_3), jnp.float32),
        "z_w": xavier(next(ks), (n_enc_3, n_z)),        "z_b": jnp.zeros((1, n_z), jnp.float32),
        "dec1_w": xavier(next(ks), (n_z, n_dec_1)),     "dec1_b": jnp.zeros((1, n_dec_1), jnp.float32),
        "dec2_w": xavier(next(ks), (n_dec_1, n_dec_2)), "dec2_b": jnp.zeros((1, n_dec_2), jnp.float32),
        "dec3_w": xavier(next(ks), (n_dec_2, n_dec_3)), "dec3_b": jnp.zeros((1, n_dec_3), jnp.float32),
        "xbar_w": xavier(next(ks), (n_dec_3, n_input)), "xbar_b": jnp.zeros((1, n_input), jnp.float32),
        # GNN layers (no bias in SDCN's GNNLayer)
        "g1_w": xavier(next(ks), (n_input, n_enc_1)),
        "g2_w": xavier(next(ks), (n_enc_1, n_enc_2)),
        "g3_w": xavier(next(ks), (n_enc_2, n_enc_3)),
        "g4_w": xavier(next(ks), (n_enc_3, n_z)),
        "g5_w": xavier(next(ks), (n_z, n_clusters)),
        # cluster centers, stored pre-transposed as (n_z, n_clusters)
        "cluster_t": xavier(next(ks), (n_clusters, n_z)).T,
    }

    # inputs: node features + row-normalized adjacency (dense; torch.spmm == dense mm here)
    x = jax.random.normal(next(ks), (N, n_input), dtype=jnp.float32)
    a_raw = jnp.abs(jax.random.normal(next(ks), (N, N), dtype=jnp.float32)) + jnp.eye(N, dtype=jnp.float32)
    adj = a_raw / jnp.sum(a_raw, axis=1, keepdims=True)

    # ---- 1) fused full SDCN forward (demo size) ----
    outs = sdcn_forward(x, adj, p, v)
    outs = jax.block_until_ready(outs)

    refs = sdcn_reference(x, adj, p, v)
    names = ["x_bar", "q", "predict", "z", "h"]
    # predict / q go through approx-EUP reciprocals (~2^-12 rel error) → looser tol.
    tols = {"x_bar": 1e-4, "z": 1e-4, "h": 1e-4, "predict": 2e-3, "q": 2e-3}
    for name, o, r in zip(names, outs, refs):
        assert o.shape == r.shape and o.dtype == r.dtype, name
        assert jnp.allclose(o, r, atol=tols[name], rtol=tols[name]), name

    # ---- 2) production-tiled GNN layer (bf16 adj stream, tiled reduction) ----
    N2 = 256
    x2 = jax.random.normal(next(ks), (N2, n_input), dtype=jnp.float32)
    a2 = jnp.abs(jax.random.normal(next(ks), (N2, N2), dtype=jnp.float32)) + jnp.eye(N2, dtype=jnp.float32)
    adj2 = a2 / jnp.sum(a2, axis=1, keepdims=True)

    h_tiled = gnn_layer_tiled(x2, p["g1_w"], adj2, relu=True,
                              operand_dtype=jnp.bfloat16, tm=128, tk=128)
    h_tiled = jax.block_until_ready(h_tiled)
    h_ref = jax.nn.relu(adj2 @ (x2 @ p["g1_w"]))
    assert h_tiled.shape == h_ref.shape
    # bf16 MXU operands on the adj stream → loose tolerance vs f32 reference.
    assert jnp.allclose(h_tiled, h_ref, atol=2e-2, rtol=2e-2)

    print("KERNEL_OK")
</pallas_src>

<mosaic_0001>
module attributes {stable_mosaic.version = 11 : i64} {
  func.func @_sdcn_fused_kernel(%arg0: i32, %arg1: memref<16x32xf32, #tpu.memory_space<vmem>>, %arg2: memref<16x16xf32, #tpu.memory_space<vmem>>, %arg3: memref<32x64xf32, #tpu.memory_space<vmem>>, %arg4: memref<1x64xf32, #tpu.memory_space<vmem>>, %arg5: memref<64x64xf32, #tpu.memory_space<vmem>>, %arg6: memref<1x64xf32, #tpu.memory_space<vmem>>, %arg7: memref<64x32xf32, #tpu.memory_space<vmem>>, %arg8: memref<1x32xf32, #tpu.memory_space<vmem>>, %arg9: memref<32x16xf32, #tpu.memory_space<vmem>>, %arg10: memref<1x16xf32, #tpu.memory_space<vmem>>, %arg11: memref<16x32xf32, #tpu.memory_space<vmem>>, %arg12: memref<1x32xf32, #tpu.memory_space<vmem>>, %arg13: memref<32x64xf32, #tpu.memory_space<vmem>>, %arg14: memref<1x64xf32, #tpu.memory_space<vmem>>, %arg15: memref<64x64xf32, #tpu.memory_space<vmem>>, %arg16: memref<1x64xf32, #tpu.memory_space<vmem>>, %arg17: memref<64x32xf32, #tpu.memory_space<vmem>>, %arg18: memref<1x32xf32, #tpu.memory_space<vmem>>, %arg19: memref<32x64xf32, #tpu.memory_space<vmem>>, %arg20: memref<64x64xf32, #tpu.memory_space<vmem>>, %arg21: memref<64x32xf32, #tpu.memory_space<vmem>>, %arg22: memref<32x16xf32, #tpu.memory_space<vmem>>, %arg23: memref<16x4xf32, #tpu.memory_space<vmem>>, %arg24: memref<16x4xf32, #tpu.memory_space<vmem>>, %arg25: memref<16x128xf32, #tpu.memory_space<vmem>>) attributes {dimension_semantics = [#tpu.dimension_semantics<arbitrary>], iteration_bounds = array<i64: 1>, scalar_prefetch = 0 : i64, scratch_operands = 0 : i64, tpu.core_type = #tpu.core_type<tc>, window_params = [{pipeline_mode = #tpu.pipeline_mode<synchronous>, transform_indices = @transform_0, window_bounds = array<i64: 16, 32>}, {pipeline_mode = #tpu.pipeline_mode<synchronous>, transform_indices = @transform_1, window_bounds = array<i64: 16, 16>}, {pipeline_mode = #tpu.pipeline_mode<synchronous>, transform_indices = @transform_2, window_bounds = array<i64: 32, 64>}, {pipeline_mode = #tpu.pipeline_mode<synchronous>, transform_indices = @transform_3, window_bounds = array<i64: 1, 64>}, {pipeline_mode = #tpu.pipeline_mode<synchronous>, transform_indices = @transform_4, window_bounds = array<i64: 64, 64>}, {pipeline_mode = #tpu.pipeline_mode<synchronous>, transform_indices = @transform_5, window_bounds = array<i64: 1, 64>}, {pipeline_mode = #tpu.pipeline_mode<synchronous>, transform_indices = @transform_6, window_bounds = array<i64: 64, 32>}, {pipeline_mode = #tpu.pipeline_mode<synchronous>, transform_indices = @transform_7, window_bounds = array<i64: 1, 32>}, {pipeline_mode = #tpu.pipeline_mode<synchronous>, transform_indices = @transform_8, window_bounds = array<i64: 32, 16>}, {pipeline_mode = #tpu.pipeline_mode<synchronous>, transform_indices = @transform_9, window_bounds = array<i64: 1, 16>}, {pipeline_mode = #tpu.pipeline_mode<synchronous>, transform_indices = @transform_10, window_bounds = array<i64: 16, 32>}, {pipeline_mode = #tpu.pipeline_mode<synchronous>, transform_indices = @transform_11, window_bounds = array<i64: 1, 32>}, {pipeline_mode = #tpu.pipeline_mode<synchronous>, transform_indices = @transform_12, window_bounds = array<i64: 32, 64>}, {pipeline_mode = #tpu.pipeline_mode<synchronous>, transform_indices = @transform_13, window_bounds = array<i64: 1, 64>}, {pipeline_mode = #tpu.pipeline_mode<synchronous>, transform_indices = @transform_14, window_bounds = array<i64: 64, 64>}, {pipeline_mode = #tpu.pipeline_mode<synchronous>, transform_indices = @transform_15, window_bounds = array<i64: 1, 64>}, {pipeline_mode = #tpu.pipeline_mode<synchronous>, transform_indices = @transform_16, window_bounds = array<i64: 64, 32>}, {pipeline_mode = #tpu.pipeline_mode<synchronous>, transform_indices = @transform_17, window_bounds = array<i64: 1, 32>}, {pipeline_mode = #tpu.pipeline_mode<synchronous>, transform_indices = @transform_18, window_bounds = array<i64: 32, 64>}, {pipeline_mode = #tpu.pipeline_mode<synchronous>, transform_indices = @transform_19, window_bounds = array<i64: 64, 64>}, {pipeline_mode = #tpu.pipeline_mode<synchronous>, transform_indices = @transform_20, window_bounds = array<i64: 64, 32>}, {pipeline_mode = #tpu.pipeline_mode<synchronous>, transform_indices = @transform_21, window_bounds = array<i64: 32, 16>}, {pipeline_mode = #tpu.pipeline_mode<synchronous>, transform_indices = @transform_22, window_bounds = array<i64: 16, 4>}, {pipeline_mode = #tpu.pipeline_mode<synchronous>, transform_indices = @transform_23, window_bounds = array<i64: 16, 4>}, {pipeline_mode = #tpu.pipeline_mode<synchronous>, transform_indices = @transform_24, window_bounds = array<i64: 16, 128>}]} {
    %c0 = arith.constant 0 : index
    %c0_0 = arith.constant 0 : index
    %0 = vector.load %arg1[%c0, %c0_0] : memref<16x32xf32, #tpu.memory_space<vmem>>, vector<16x32xf32>
    %c0_1 = arith.constant 0 : index
    %c0_2 = arith.constant 0 : index
    %1 = vector.load %arg2[%c0_1, %c0_2] : memref<16x16xf32, #tpu.memory_space<vmem>>, vector<16x16xf32>
    %c0_3 = arith.constant 0 : index
    %c0_4 = arith.constant 0 : index
    %2 = vector.load %arg3[%c0_3, %c0_4] : memref<32x64xf32, #tpu.memory_space<vmem>>, vector<32x64xf32>
    %cst = arith.constant dense<0.000000e+00> : vector<16x64xf32>
    %3 = tpu.matmul %0, %2, %cst {dimension_numbers = #tpu.dot_dimension_numbers<[1], [0], [0], [1], [0, 0, 1, 1], [], []>} : vector<16x32xf32>, vector<32x64xf32>, vector<16x64xf32> -> vector<16x64xf32>
    %c0_5 = arith.constant 0 : index
    %c0_6 = arith.constant 0 : index
    %4 = vector.load %arg4[%c0_5, %c0_6] : memref<1x64xf32, #tpu.memory_space<vmem>>, vector<1x64xf32>
    %5 = vector.broadcast %4 : vector<1x64xf32> to vector<16x64xf32>
    %6 = arith.addf %3, %5 : vector<16x64xf32>
    %cst_7 = arith.constant 0.000000e+00 : f32
    %7 = vector.broadcast %cst_7 : f32 to vector<16x64xf32>
    %8 = arith.maximumf %6, %7 : vector<16x64xf32>
    %c0_8 = arith.constant 0 : index
    %c0_9 = arith.constant 0 : index
    %9 = vector.load %arg5[%c0_8, %c0_9] : memref<64x64xf32, #tpu.memory_space<vmem>>, vector<64x64xf32>
    %cst_10 = arith.constant dense<0.000000e+00> : vector<16x64xf32>
    %10 = tpu.matmul %8, %9, %cst_10 {dimension_numbers = #tpu.dot_dimension_numbers<[1], [0], [0], [1], [0, 0, 1, 1], [], []>} : vector<16x64xf32>, vector<64x64xf32>, vector<16x64xf32> -> vector<16x64xf32>
    %c0_11 = arith.constant 0 : index
    %c0_12 = arith.constant 0 : index
    %11 = vector.load %arg6[%c0_11, %c0_12] : memref<1x64xf32, #tpu.memory_space<vmem>>, vector<1x64xf32>
    %12 = vector.broadcast %11 : vector<1x64xf32> to vector<16x64xf32>
    %13 = arith.addf %10, %12 : vector<16x64xf32>
    %cst_13 = arith.constant 0.000000e+00 : f32
    %14 = vector.broadcast %cst_13 : f32 to vector<16x64xf32>
    %15 = arith.maximumf %13, %14 : vector<16x64xf32>
    %c0_14 = arith.constant 0 : index
    %c0_15 = arith.constant 0 : index
    %16 = vector.load %arg7[%c0_14, %c0_15] : memref<64x32xf32, #tpu.memory_space<vmem>>, vector<64x32xf32>
    %cst_16 = arith.constant dense<0.000000e+00> : vector<16x32xf32>
    %17 = tpu.matmul %15, %16, %cst_16 {dimension_numbers = #tpu.dot_dimension_numbers<[1], [0], [0], [1], [0, 0, 1, 1], [], []>} : vector<16x64xf32>, vector<64x32xf32>, vector<16x32xf32> -> vector<16x32xf32>
    %c0_17 = arith.constant 0 : index
    %c0_18 = arith.constant 0 : index
    %18 = vector.load %arg8[%c0_17, %c0_18] : memref<1x32xf32, #tpu.memory_space<vmem>>, vector<1x32xf32>
    %19 = vector.broadcast %18 : vector<1x32xf32> to vector<16x32xf32>
    %20 = arith.addf %17, %19 : vector<16x32xf32>
    %cst_19 = arith.constant 0.000000e+00 : f32
    %21 = vector.broadcast %cst_19 : f32 to vector<16x32xf32>
    %22 = arith.maximumf %20, %21 : vector<16x32xf32>
    %c0_20 = arith.constant 0 : index
    %c0_21 = arith.constant 0 : index
    %23 = vector.load %arg9[%c0_20, %c0_21] : memref<32x16xf32, #tpu.memory_space<vmem>>, vector<32x16xf32>
    %cst_22 = arith.constant dense<0.000000e+00> : vector<16x16xf32>
    %24 = tpu.matmul %22, %23, %cst_22 {dimension_numbers = #tpu.dot_dimension_numbers<[1], [0], [0], [1], [0, 0, 1, 1], [], []>} : vector<16x32xf32>, vector<32x16xf32>, vector<16x16xf32> -> vector<16x16xf32>
    %c0_23 = arith.constant 0 : index
    %c0_24 = arith.constant 0 : index
    %25 = vector.load %arg10[%c0_23, %c0_24] : memref<1x16xf32, #tpu.memory_space<vmem>>, vector<1x16xf32>
    %26 = vector.broadcast %25 : vector<1x16xf32> to vector<16x16xf32>
    %27 = arith.addf %24, %26 : vector<16x16xf32>
    %c0_25 = arith.constant 0 : index
    %c0_26 = arith.constant 0 : index
    %28 = vector.load %arg11[%c0_25, %c0_26] : memref<16x32xf32, #tpu.memory_space<vmem>>, vector<16x32xf32>
    %cst_27 = arith.constant dense<0.000000e+00> : vector<16x32xf32>
    %29 = tpu.matmul %27, %28, %cst_27 {dimension_numbers = #tpu.dot_dimension_numbers<[1], [0], [0], [1], [0, 0, 1, 1], [], []>} : vector<16x16xf32>, vector<16x32xf32>, vector<16x32xf32> -> vector<16x32xf32>
    %c0_28 = arith.constant 0 : index
    %c0_29 = arith.constant 0 : index
    %30 = vector.load %arg12[%c0_28, %c0_29] : memref<1x32xf32, #tpu.memory_space<vmem>>, vector<1x32xf32>
    %31 = vector.broadcast %30 : vector<1x32xf32> to vector<16x32xf32>
    %32 = arith.addf %29, %31 : vector<16x32xf32>
    %cst_30 = arith.constant 0.000000e+00 : f32
    %33 = vector.broadcast %cst_30 : f32 to vector<16x32xf32>
    %34 = arith.maximumf %32, %33 : vector<16x32xf32>
    %c0_31 = arith.constant 0 : index
    %c0_32 = arith.constant 0 : index
    %35 = vector.load %arg13[%c0_31, %c0_32] : memref<32x64xf32, #tpu.memory_space<vmem>>, vector<32x64xf32>
    %cst_33 = arith.constant dense<0.000000e+00> : vector<16x64xf32>
    %36 = tpu.matmul %34, %35, %cst_33 {dimension_numbers = #tpu.dot_dimension_numbers<[1], [0], [0], [1], [0, 0, 1, 1], [], []>} : vector<16x32xf32>, vector<32x64xf32>, vector<16x64xf32> -> vector<16x64xf32>
    %c0_34 = arith.constant 0 : index
    %c0_35 = arith.constant 0 : index
    %37 = vector.load %arg14[%c0_34, %c0_35] : memref<1x64xf32, #tpu.memory_space<vmem>>, vector<1x64xf32>
    %38 = vector.broadcast %37 : vector<1x64xf32> to vector<16x64xf32>
    %39 = arith.addf %36, %38 : vector<16x64xf32>
    %cst_36 = arith.constant 0.000000e+00 : f32
    %40 = vector.broadcast %cst_36 : f32 to vector<16x64xf32>
    %41 = arith.maximumf %39, %40 : vector<16x64xf32>
    %c0_37 = arith.constant 0 : index
    %c0_38 = arith.constant 0 : index
    %42 = vector.load %arg15[%c0_37, %c0_38] : memref<64x64xf32, #tpu.memory_space<vmem>>, vector<64x64xf32>
    %cst_39 = arith.constant dense<0.000000e+00> : vector<16x64xf32>
    %43 = tpu.matmul %41, %42, %cst_39 {dimension_numbers = #tpu.dot_dimension_numbers<[1], [0], [0], [1], [0, 0, 1, 1], [], []>} : vector<16x64xf32>, vector<64x64xf32>, vector<16x64xf32> -> vector<16x64xf32>
    %c0_40 = arith.constant 0 : index
    %c0_41 = arith.constant 0 : index
    %44 = vector.load %arg16[%c0_40, %c0_41] : memref<1x64xf32, #tpu.memory_space<vmem>>, vector<1x64xf32>
    %45 = vector.broadcast %44 : vector<1x64xf32> to vector<16x64xf32>
    %46 = arith.addf %43, %45 : vector<16x64xf32>
    %cst_42 = arith.constant 0.000000e+00 : f32
    %47 = vector.broadcast %cst_42 : f32 to vector<16x64xf32>
    %48 = arith.maximumf %46, %47 : vector<16x64xf32>
    %c0_43 = arith.constant 0 : index
    %c0_44 = arith.constant 0 : index
    %49 = vector.load %arg17[%c0_43, %c0_44] : memref<64x32xf32, #tpu.memory_space<vmem>>, vector<64x32xf32>
    %cst_45 = arith.constant dense<0.000000e+00> : vector<16x32xf32>
    %50 = tpu.matmul %48, %49, %cst_45 {dimension_numbers = #tpu.dot_dimension_numbers<[1], [0], [0], [1], [0, 0, 1, 1], [], []>} : vector<16x64xf32>, vector<64x32xf32>, vector<16x32xf32> -> vector<16x32xf32>
    %c0_46 = arith.constant 0 : index
    %c0_47 = arith.constant 0 : index
    %51 = vector.load %arg18[%c0_46, %c0_47] : memref<1x32xf32, #tpu.memory_space<vmem>>, vector<1x32xf32>
    %52 = vector.broadcast %51 : vector<1x32xf32> to vector<16x32xf32>
    %53 = arith.addf %50, %52 : vector<16x32xf32>
    %c0_48 = arith.constant 0 : index
    %c0_49 = arith.constant 0 : index
    %54 = vector.load %arg19[%c0_48, %c0_49] : memref<32x64xf32, #tpu.memory_space<vmem>>, vector<32x64xf32>
    %cst_50 = arith.constant dense<0.000000e+00> : vector<16x64xf32>
    %55 = tpu.matmul %0, %54, %cst_50 {dimension_numbers = #tpu.dot_dimension_numbers<[1], [0], [0], [1], [0, 0, 1, 1], [], []>} : vector<16x32xf32>, vector<32x64xf32>, vector<16x64xf32> -> vector<16x64xf32>
    %cst_51 = arith.constant dense<0.000000e+00> : vector<16x64xf32>
    %56 = tpu.matmul %1, %55, %cst_51 {dimension_numbers = #tpu.dot_dimension_numbers<[1], [0], [0], [1], [0, 0, 1, 1], [], []>} : vector<16x16xf32>, vector<16x64xf32>, vector<16x64xf32> -> vector<16x64xf32>
    %cst_52 = arith.constant 0.000000e+00 : f32
    %57 = vector.broadcast %cst_52 : f32 to vector<16x64xf32>
    %58 = arith.maximumf %56, %57 : vector<16x64xf32>
    %59 = arith.addf %58, %8 : vector<16x64xf32>
    %cst_53 = arith.constant 5.000000e-01 : f32
    %60 = vector.broadcast %cst_53 : f32 to vector<16x64xf32>
    %61 = arith.mulf %60, %59 : vector<16x64xf32>
    %c0_54 = arith.constant 0 : index
    %c0_55 = arith.constant 0 : index
    %62 = vector.load %arg20[%c0_54, %c0_55] : memref<64x64xf32, #tpu.memory_space<vmem>>, vector<64x64xf32>
    %cst_56 = arith.constant dense<0.000000e+00> : vector<16x64xf32>
    %63 = tpu.matmul %61, %62, %cst_56 {dimension_numbers = #tpu.dot_dimension_numbers<[1], [0], [0], [1], [0, 0, 1, 1], [], []>} : vector<16x64xf32>, vector<64x64xf32>, vector<16x64xf32> -> vector<16x64xf32>
    %cst_57 = arith.constant dense<0.000000e+00> : vector<16x64xf32>
    %64 = tpu.matmul %1, %63, %cst_57 {dimension_numbers = #tpu.dot_dimension_numbers<[1], [0], [0], [1], [0, 0, 1, 1], [], []>} : vector<16x16xf32>, vector<16x64xf32>, vector<16x64xf32> -> vector<16x64xf32>
    %cst_58 = arith.constant 0.000000e+00 : f32
    %65 = vector.broadcast %cst_58 : f32 to vector<16x64xf32>
    %66 = arith.maximumf %64, %65 : vector<16x64xf32>
    %67 = arith.addf %66, %15 : vector<16x64xf32>
    %cst_59 = arith.constant 5.000000e-01 : f32
    %68 = vector.broadcast %cst_59 : f32 to vector<16x64xf32>
    %69 = arith.mulf %68, %67 : vector<16x64xf32>
    %c0_60 = arith.constant 0 : index
    %c0_61 = arith.constant 0 : index
    %70 = vector.load %arg21[%c0_60, %c0_61] : memref<64x32xf32, #tpu.memory_space<vmem>>, vector<64x32xf32>
    %cst_62 = arith.constant dense<0.000000e+00> : vector<16x32xf32>
    %71 = tpu.matmul %69, %70, %cst_62 {dimension_numbers = #tpu.dot_dimension_numbers<[1], [0], [0], [1], [0, 0, 1, 1], [], []>} : vector<16x64xf32>, vector<64x32xf32>, vector<16x32xf32> -> vector<16x32xf32>
    %cst_63 = arith.constant dense<0.000000e+00> : vector<16x32xf32>
    %72 = tpu.matmul %1, %71, %cst_63 {dimension_numbers = #tpu.dot_dimension_numbers<[1], [0], [0], [1], [0, 0, 1, 1], [], []>} : vector<16x16xf32>, vector<16x32xf32>, vector<16x32xf32> -> vector<16x32xf32>
    %cst_64 = arith.constant 0.000000e+00 : f32
    %73 = vector.broadcast %cst_64 : f32 to vector<16x32xf32>
    %74 = arith.maximumf %72, %73 : vector<16x32xf32>
    %75 = arith.addf %74, %22 : vector<16x32xf32>
    %cst_65 = arith.constant 5.000000e-01 : f32
    %76 = vector.broadcast %cst_65 : f32 to vector<16x32xf32>
    %77 = arith.mulf %76, %75 : vector<16x32xf32>
    %c0_66 = arith.constant 0 : index
    %c0_67 = arith.constant 0 : index
    %78 = vector.load %arg22[%c0_66, %c0_67] : memref<32x16xf32, #tpu.memory_space<vmem>>, vector<32x16xf32>
    %cst_68 = arith.constant dense<0.000000e+00> : vector<16x16xf32>
    %79 = tpu.matmul %77, %78, %cst_68 {dimension_numbers = #tpu.dot_dimension_numbers<[1], [0], [0], [1], [0, 0, 1, 1], [], []>} : vector<16x32xf32>, vector<32x16xf32>, vector<16x16xf32> -> vector<16x16xf32>
    %cst_69 = arith.constant dense<0.000000e+00> : vector<16x16xf32>
    %80 = tpu.matmul %1, %79, %cst_69 {dimension_numbers = #tpu.dot_dimension_numbers<[1], [0], [0], [1], [0, 0, 1, 1], [], []>} : vector<16x16xf32>, vector<16x16xf32>, vector<16x16xf32> -> vector<16x16xf32>
    %cst_70 = arith.constant 0.000000e+00 : f32
    %81 = vector.broadcast %cst_70 : f32 to vector<16x16xf32>
    %82 = arith.maximumf %80, %81 : vector<16x16xf32>
    %83 = arith.addf %82, %27 : vector<16x16xf32>
    %cst_71 = arith.constant 5.000000e-01 : f32
    %84 = vector.broadcast %cst_71 : f32 to vector<16x16xf32>
    %85 = arith.mulf %84, %83 : vector<16x16xf32>
    %c0_72 = arith.constant 0 : index
    %c0_73 = arith.constant 0 : index
    %86 = vector.load %arg23[%c0_72, %c0_73] : memref<16x4xf32, #tpu.memory_space<vmem>>, vector<16x4xf32>
    %cst_74 = arith.constant dense<0.000000e+00> : vector<16x4xf32>
    %87 = tpu.matmul %85, %86, %cst_74 {dimension_numbers = #tpu.dot_dimension_numbers<[1], [0], [0], [1], [0, 0, 1, 1], [], []>} : vector<16x16xf32>, vector<16x4xf32>, vector<16x4xf32> -> vector<16x4xf32>
    %cst_75 = arith.constant dense<0.000000e+00> : vector<16x4xf32>
    %88 = tpu.matmul %1, %87, %cst_75 {dimension_numbers = #tpu.dot_dimension_numbers<[1], [0], [0], [1], [0, 0, 1, 1], [], []>} : vector<16x16xf32>, vector<16x4xf32>, vector<16x4xf32> -> vector<16x4xf32>
    %cst_76 = arith.constant dense<0xFF800000> : vector<16xf32>
    %89 = vector.multi_reduction <maximumf>, %88, %cst_76 [1] : vector<16x4xf32> to vector<16xf32>
    %90 = vector.shape_cast %89 : vector<16xf32> to vector<16x1xf32>
    %91 = vector.broadcast %90 : vector<16x1xf32> to vector<16x4xf32>
    %92 = arith.subf %88, %91 : vector<16x4xf32>
    %93 = math.exp %92 : vector<16x4xf32>
    %cst_77 = arith.constant dense<0.000000e+00> : vector<16xf32>
    %94 = vector.multi_reduction <add>, %93, %cst_77 [1] : vector<16x4xf32> to vector<16xf32>
    %95 = vector.shape_cast %94 : vector<16xf32> to vector<16x1xf32>
    %96 = tpu.reciprocal %95 {approx = true} : vector<16x1xf32> -> vector<16x1xf32>
    %97 = vector.broadcast %96 : vector<16x1xf32> to vector<16x4xf32>
    %98 = arith.mulf %93, %97 : vector<16x4xf32>
    %c0_78 = arith.constant 0 : index
    %c0_79 = arith.constant 0 : index
    %99 = vector.load %arg24[%c0_78, %c0_79] : memref<16x4xf32, #tpu.memory_space<vmem>>, vector<16x4xf32>
    %100 = arith.mulf %27, %27 : vector<16x16xf32>
    %cst_80 = arith.constant dense<0.000000e+00> : vector<16xf32>
    %101 = vector.multi_reduction <add>, %100, %cst_80 [1] : vector<16x16xf32> to vector<16xf32>
    %102 = vector.shape_cast %101 : vector<16xf32> to vector<16x1xf32>
    %103 = arith.mulf %99, %99 : vector<16x4xf32>
    %cst_81 = arith.constant dense<0.000000e+00> : vector<4xf32>
    %104 = vector.multi_reduction <add>, %103, %cst_81 [0] : vector<16x4xf32> to vector<4xf32>
    %105 = vector.shape_cast %104 : vector<4xf32> to vector<1x4xf32>
    %cst_82 = arith.constant dense<0.000000e+00> : vector<16x4xf32>
    %106 = tpu.matmul %27, %99, %cst_82 {dimension_numbers = #tpu.dot_dimension_numbers<[1], [0], [0], [1], [0, 0, 1, 1], [], []>} : vector<16x16xf32>, vector<16x4xf32>, vector<16x4xf32> -> vector<16x4xf32>
    %107 = vector.broadcast %102 : vector<16x1xf32> to vector<16x4xf32>
    %108 = vector.broadcast %105 : vector<1x4xf32> to vector<16x4xf32>
    %109 = arith.addf %107, %108 : vector<16x4xf32>
    %cst_83 = arith.constant 2.000000e+00 : f32
    %110 = vector.broadcast %cst_83 : f32 to vector<16x4xf32>
    %111 = arith.mulf %110, %106 : vector<16x4xf32>
    %112 = arith.subf %109, %111 : vector<16x4xf32>
    %cst_84 = arith.constant 0.000000e+00 : f32
    %113 = vector.broadcast %cst_84 : f32 to vector<16x4xf32>
    %114 = arith.maximumf %112, %113 : vector<16x4xf32>
    %cst_85 = arith.constant 1.000000e+00 : f32
    %115 = vector.broadcast %cst_85 : f32 to vector<16x4xf32>
    %116 = arith.mulf %114, %115 : vector<16x4xf32>
    %cst_86 = arith.constant 1.000000e+00 : f32
    %117 = vector.broadcast %cst_86 : f32 to vector<16x4xf32>
    %118 = arith.addf %117, %116 : vector<16x4xf32>
    %119 = tpu.reciprocal %118 {approx = true} : vector<16x4xf32> -> vector<16x4xf32>
    %cst_87 = arith.constant dense<0.000000e+00> : vector<16xf32>
    %120 = vector.multi_reduction <add>, %119, %cst_87 [1] : vector<16x4xf32> to vector<16xf32>
    %121 = vector.shape_cast %120 : vector<16xf32> to vector<16x1xf32>
    %122 = tpu.reciprocal %121 {approx = true} : vector<16x1xf32> -> vector<16x1xf32>
    %123 = vector.broadcast %122 : vector<16x1xf32> to vector<16x4xf32>
    %124 = arith.mulf %119, %123 : vector<16x4xf32>
    %cst_88 = arith.constant 0.000000e+00 : f32
    %125 = vector.broadcast %cst_88 : f32 to vector<16x68xf32>
    %126 = tpu.concatenate %53, %27, %88, %98, %124, %125 in 1 : vector<16x32xf32>, vector<16x16xf32>, vector<16x4xf32>, vector<16x4xf32>, vector<16x4xf32>, vector<16x68xf32> -> vector<16x128xf32>
    %c0_89 = arith.constant 0 : index
    %c0_90 = arith.constant 0 : index
    %127 = vector.load %arg25[%c0_89, %c0_90] : memref<16x128xf32, #tpu.memory_space<vmem>>, vector<16x128xf32>
    tpu.vector_store %arg25[%c0_89, %c0_90], %126 {strides = array<i32>} : memref<16x128xf32, #tpu.memory_space<vmem>>, vector<16x128xf32>,
    return
  }
  func.func @transform_0(%arg0: i32) -> (i32, i32) {
    %c0_i32 = arith.constant 0 : i32
    %c0_i32_0 = arith.constant 0 : i32
    %c0_i32_1 = arith.constant 0 : i32
    return %c0_i32, %c0_i32_0 : i32, i32
  }
  func.func @transform_1(%arg0: i32) -> (i32, i32) {
    %c0_i32 = arith.constant 0 : i32
    %c0_i32_0 = arith.constant 0 : i32
    %c0_i32_1 = arith.constant 0 : i32
    return %c0_i32, %c0_i32_0 : i32, i32
  }
  func.func @transform_2(%arg0: i32) -> (i32, i32) {
    %c0_i32 = arith.constant 0 : i32
    %c0_i32_0 = arith.constant 0 : i32
    %c0_i32_1 = arith.constant 0 : i32
    return %c0_i32, %c0_i32_0 : i32, i32
  }
  func.func @transform_3(%arg0: i32) -> (i32, i32) {
    %c0_i32 = arith.constant 0 : i32
    %c0_i32_0 = arith.constant 0 : i32
    %c0_i32_1 = arith.constant 0 : i32
    return %c0_i32, %c0_i32_0 : i32, i32
  }
  func.func @transform_4(%arg0: i32) -> (i32, i32) {
    %c0_i32 = arith.constant 0 : i32
    %c0_i32_0 = arith.constant 0 : i32
    %c0_i32_1 = arith.constant 0 : i32
    return %c0_i32, %c0_i32_0 : i32, i32
  }
  func.func @transform_5(%arg0: i32) -> (i32, i32) {
    %c0_i32 = arith.constant 0 : i32
    %c0_i32_0 = arith.constant 0 : i32
    %c0_i32_1 = arith.constant 0 : i32
    return %c0_i32, %c0_i32_0 : i32, i32
  }
  func.func @transform_6(%arg0: i32) -> (i32, i32) {
    %c0_i32 = arith.constant 0 : i32
    %c0_i32_0 = arith.constant 0 : i32
    %c0_i32_1 = arith.constant 0 : i32
    return %c0_i32, %c0_i32_0 : i32, i32
  }
  func.func @transform_7(%arg0: i32) -> (i32, i32) {
    %c0_i32 = arith.constant 0 : i32
    %c0_i32_0 = arith.constant 0 : i32
    %c0_i32_1 = arith.constant 0 : i32
    return %c0_i32, %c0_i32_0 : i32, i32
  }
  func.func @transform_8(%arg0: i32) -> (i32, i32) {
    %c0_i32 = arith.constant 0 : i32
    %c0_i32_0 = arith.constant 0 : i32
    %c0_i32_1 = arith.constant 0 : i32
    return %c0_i32, %c0_i32_0 : i32, i32
  }
  func.func @transform_9(%arg0: i32) -> (i32, i32) {
    %c0_i32 = arith.constant 0 : i32
    %c0_i32_0 = arith.constant 0 : i32
    %c0_i32_1 = arith.constant 0 : i32
    return %c0_i32, %c0_i32_0 : i32, i32
  }
  func.func @transform_10(%arg0: i32) -> (i32, i32) {
    %c0_i32 = arith.constant 0 : i32
    %c0_i32_0 = arith.constant 0 : i32
    %c0_i32_1 = arith.constant 0 : i32
    return %c0_i32, %c0_i32_0 : i32, i32
  }
  func.func @transform_11(%arg0: i32) -> (i32, i32) {
    %c0_i32 = arith.constant 0 : i32
    %c0_i32_0 = arith.constant 0 : i32
    %c0_i32_1 = arith.constant 0 : i32
    return %c0_i32, %c0_i32_0 : i32, i32
  }
  func.func @transform_12(%arg0: i32) -> (i32, i32) {
    %c0_i32 = arith.constant 0 : i32
    %c0_i32_0 = arith.constant 0 : i32
    %c0_i32_1 = arith.constant 0 : i32
    return %c0_i32, %c0_i32_0 : i32, i32
  }
  func.func @transform_13(%arg0: i32) -> (i32, i32) {
    %c0_i32 = arith.constant 0 : i32
    %c0_i32_0 = arith.constant 0 : i32
    %c0_i32_1 = arith.constant 0 : i32
    return %c0_i32, %c0_i32_0 : i32, i32
  }
  func.func @transform_14(%arg0: i32) -> (i32, i32) {
    %c0_i32 = arith.constant 0 : i32
    %c0_i32_0 = arith.constant 0 : i32
    %c0_i32_1 = arith.constant 0 : i32
    return %c0_i32, %c0_i32_0 : i32, i32
  }
  func.func @transform_15(%arg0: i32) -> (i32, i32) {
    %c0_i32 = arith.constant 0 : i32
    %c0_i32_0 = arith.constant 0 : i32
    %c0_i32_1 = arith.constant 0 : i32
    return %c0_i32, %c0_i32_0 : i32, i32
  }
  func.func @transform_16(%arg0: i32) -> (i32, i32) {
    %c0_i32 = arith.constant 0 : i32
    %c0_i32_0 = arith.constant 0 : i32
    %c0_i32_1 = arith.constant 0 : i32
    return %c0_i32, %c0_i32_0 : i32, i32
  }
  func.func @transform_17(%arg0: i32) -> (i32, i32) {
    %c0_i32 = arith.constant 0 : i32
    %c0_i32_0 = arith.constant 0 : i32
    %c0_i32_1 = arith.constant 0 : i32
    return %c0_i32, %c0_i32_0 : i32, i32
  }
  func.func @transform_18(%arg0: i32) -> (i32, i32) {
    %c0_i32 = arith.constant 0 : i32
    %c0_i32_0 = arith.constant 0 : i32
    %c0_i32_1 = arith.constant 0 : i32
    return %c0_i32, %c0_i32_0 : i32, i32
  }
  func.func @transform_19(%arg0: i32) -> (i32, i32) {
    %c0_i32 = arith.constant 0 : i32
    %c0_i32_0 = arith.constant 0 : i32
    %c0_i32_1 = arith.constant 0 : i32
    return %c0_i32, %c0_i32_0 : i32, i32
  }
  func.func @transform_20(%arg0: i32) -> (i32, i32) {
    %c0_i32 = arith.constant 0 : i32
    %c0_i32_0 = arith.constant 0 : i32
    %c0_i32_1 = arith.constant 0 : i32
    return %c0_i32, %c0_i32_0 : i32, i32
  }
  func.func @transform_21(%arg0: i32) -> (i32, i32) {
    %c0_i32 = arith.constant 0 : i32
    %c0_i32_0 = arith.constant 0 : i32
    %c0_i32_1 = arith.constant 0 : i32
    return %c0_i32, %c0_i32_0 : i32, i32
  }
  func.func @transform_22(%arg0: i32) -> (i32, i32) {
    %c0_i32 = arith.constant 0 : i32
    %c0_i32_0 = arith.constant 0 : i32
    %c0_i32_1 = arith.constant 0 : i32
    return %c0_i32, %c0_i32_0 : i32, i32
  }
  func.func @transform_23(%arg0: i32) -> (i32, i32) {
    %c0_i32 = arith.constant 0 : i32
    %c0_i32_0 = arith.constant 0 : i32
    %c0_i32_1 = arith.constant 0 : i32
    return %c0_i32, %c0_i32_0 : i32, i32
  }
  func.func @transform_24(%arg0: i32) -> (i32, i32) {
    %c0_i32 = arith.constant 0 : i32
    %c0_i32_0 = arith.constant 0 : i32
    %c0_i32_1 = arith.constant 0 : i32
    return %c0_i32, %c0_i32_0 : i32, i32
  }
}

</mosaic_0001>

<bundles_post_ra>
// kernel: tpu_custom_call.1
= control target key start
LH: loop header
LB: loop body
LE: loop exit
PB: predicated region body
PF: predicated region fallthrough
CT: control target
= control target key end

     0   :  { %s3137_s0 = inlined_call_operand.hbm [shape: f32[16,32], index: 0, kind: input, shape index: {}]   ;;  %s3138_s1 = inlined_call_operand.hbm [shape: f32[16,16], index: 1, kind: input, shape index: {}]   ;;  %s3139_s2 = inlined_call_operand.vmem [shape: f32[32,64], index: 2, kind: input, shape index: {}]   ;;  %s3140_s3 = inlined_call_operand.vmem [shape: f32[1,64], index: 3, kind: input, shape index: {}]   ;;  %s3141_s4 = inlined_call_operand.vmem [shape: f32[64,64], index: 4, kind: input, shape index: {}]   ;;  %s3142_s5 = inlined_call_operand.vmem [shape: f32[1,64], index: 5, kind: input, shape index: {}]   ;;  %s3143_s6 = inlined_call_operand.vmem [shape: f32[64,32], index: 6, kind: input, shape index: {}]   ;;  %s3144_s7 = inlined_call_operand.vmem [shape: f32[1,32], index: 7, kind: input, shape index: {}]   ;;  %s3145_s8 = inlined_call_operand.vmem [shape: f32[32,16], index: 8, kind: input, shape index: {}]   ;;  %s3146_s9 = inlined_call_operand.vmem [shape: f32[1,16], index: 9, kind: input, shape index: {}]   ;;  %s3147_s10 = inlined_call_operand.vmem [shape: f32[16,32], index: 10, kind: input, shape index: {}]   ;;  %s3148_s11 = inlined_call_operand.vmem [shape: f32[1,32], index: 11, kind: input, shape index: {}]   ;;  %s3149_s12 = inlined_call_operand.vmem [shape: f32[32,64], index: 12, kind: input, shape index: {}]   ;;  %s3150_s13 = inlined_call_operand.vmem [shape: f32[1,64], index: 13, kind: input, shape index: {}]   ;;  %s3151_s14 = inlined_call_operand.vmem [shape: f32[64,64], index: 14, kind: input, shape index: {}]   ;;  %s3152_s15 = inlined_call_operand.vmem [shape: f32[1,64], index: 15, kind: input, shape index: {}]   ;;  %s3153_s16 = inlined_call_operand.vmem [shape: f32[64,32], index: 16, kind: input, shape index: {}]   ;;  %s3154_s17 = inlined_call_operand.vmem [shape: f32[1,32], index: 17, kind: input, shape index: {}]   ;;  %s3155_s18 = inlined_call_operand.vmem [shape: f32[32,64], index: 18, kind: input, shape index: {}]   ;;  %s3156_s19 = inlined_call_operand.vmem [shape: f32[64,64], index: 19, kind: input, shape index: {}]   ;;  %s3157_s20 = inlined_call_operand.vmem [shape: f32[64,32], index: 20, kind: input, shape index: {}]   ;;  %s3158_s21 = inlined_call_operand.vmem [shape: f32[32,16], index: 21, kind: input, shape index: {}]   ;;  %s3159_s22 = inlined_call_operand.vmem [shape: f32[16,4], index: 22, kind: input, shape index: {}]   ;;  %s3160_s23 = inlined_call_operand.vmem [shape: f32[16,4], index: 23, kind: input, shape index: {}]   ;;  %s3161_s24 = inlined_call_operand.hbm [shape: f32[16,128], index: 24, kind: output, shape index: {}]  }
   0x1   :  { %3169 = sst [smem:[#allocation11_spill]] %s3137_s0 }
   0x2   :  { %3170 = sst [smem:[#allocation12_spill]] %s3138_s1 }
   0x3   :  { %3171 = sst [smem:[#allocation13_spill]] %s3139_s2 }
   0x4   :  { %3172 = sst [smem:[#allocation14_spill]] %s3140_s3 }
   0x5   :  { %3173 = sst [smem:[#allocation15_spill]] %s3141_s4 }
   0x6   :  { %3174 = sst [smem:[#allocation16_spill]] %s3142_s5 }
   0x7   :  { %3175 = sst [smem:[#allocation17_spill]] %s3143_s6 }
   0x8   :  { %3176 = sst [smem:[#allocation18_spill]] %s3144_s7 }
   0x9   :  { %3177 = sst [smem:[#allocation19_spill]] %s3145_s8 }
   0xa   :  { %3178 = sst [smem:[#allocation20_spill]] %s3154_s17 }
   0xb   :  { %3179 = sst [smem:[#allocation21_spill]] %s3161_s24 }
   0xc   :  { %29 = vsyncpa [#allocation3], 0 }
   0xd   :  { %30 = vsyncpa [#allocation6], 0 }
   0xe   :  { %31 = vsyncpa [#allocation4], 0  ;;  %s2568_s5 = smov [#allocation2]   ;;  %s3180_s6 = sld [smem:[#allocation11_spill]] }
   0xf   :  { %s37_s26 = sshll.u32 %s2568_s5, 4  ;;  %s38_s26 = int_to_ptr.vmem [resolvable:$true] %s37_s26 }
  0x14   :  { %s2496_s2 = scalar_lea.hbm %s3180_s6, 256 }
  0x15   :  { %p2497_p0 = scmp.ne.s32.totalorder %s3180_s6, %s2496_s2  ;;  %p2500_p1 = scmp.lt.u32.totalorder %s2496_s2, %s3180_s6 }
  0x17   :  { %p2502_p2 = pnand %p2500_p1, %p2497_p0 }
  0x19   :  { %2505 = shalt.err (!%p2502_p2)
}
  0x1a   :  { %s2506_s3 = scalar_lea.vmem %s38_s26, 256  ;;  %p2511_p4 = scmp.lt.s32.totalorder %s38_s26, %s38_s26 }
  0x1b   :  { %p2507_p3 = scmp.ne.s32.totalorder %s38_s26, %s2506_s3  ;;  %p2512_p5 = scmp.lt.s32.totalorder %s2506_s3, %s2506_s3 }
  0x1d   :  { %p2513_p6 = por %p2512_p5, %p2511_p4 }
  0x1f   :  { %p2514_p7 = pnand %p2513_p6, %p2507_p3 }
  0x21   :  { %2517 = shalt.err (!%p2514_p7)
}
  0x22   :  { %s2569_s25 = smov 128   ;;  %s2570_s8 = smov 8  }
  0x23   :  { %43 = dma.hbm_to_vmem [thread:$0]  %s3180_s6, 256, %s38_s26, [#allocation3], %s2569_s25, %s2569_s25, %s2570_s8  }
  0x24   :  { %s2571_s5 = smov [#allocation5]   ;;  %s3181_s29 = sld [smem:[#allocation12_spill]] }
  0x25   :  { %s49_s27 = sshll.u32 %s2571_s5, 4  ;;  %s50_s27 = int_to_ptr.vmem [resolvable:$true] %s49_s27 }
  0x2a   :  { %s2518_s0 = scalar_lea.hbm %s3181_s29, 256 }
  0x2b   :  { %p2519_p8 = scmp.ne.s32.totalorder %s3181_s29, %s2518_s0  ;;  %p2522_p9 = scmp.lt.u32.totalorder %s2518_s0, %s3181_s29 }
  0x2d   :  { %p2524_p10 = pnand %p2522_p9, %p2519_p8 }
  0x2f   :  { %2527 = shalt.err (!%p2524_p10)
}
  0x30   :  { %s2528_s17 = scalar_lea.vmem %s50_s27, 256  ;;  %p2533_p12 = scmp.lt.s32.totalorder %s50_s27, %s50_s27 }
  0x31   :  { %p2529_p11 = scmp.ne.s32.totalorder %s50_s27, %s2528_s17  ;;  %p2534_p13 = scmp.lt.s32.totalorder %s2528_s17, %s2528_s17 }
  0x33   :  { %p2535_p0 = por %p2534_p13, %p2533_p12 }
  0x35   :  { %p2536_p1 = pnand %p2535_p0, %p2529_p11 }
  0x37   :  { %2539 = shalt.err (!%p2536_p1)
}
  0x38   :  { %55 = dma.hbm_to_vmem [thread:$0]  %s3181_s29, 256, %s50_s27, [#allocation6], %s2569_s25, %s2569_s25, %s2570_s8  }
  0x39   :  { %2562 = dma.done.wait [#allocation3], 256  }
  0x3a   :  { %2563 = vsyncadd [#allocation3], 4294967040 }
  0x3b   :  { %2564 = dma.done.wait [#allocation6], 256  }
  0x3c   :  { %2565 = vsyncadd [#allocation6], 4294967040  ;;  %vm121_vm0 = vcmask 261120   ;;  %s3182_s1 = sld [smem:[#allocation13_spill]]  ;;  %v2744_v5 = vld [vmem:[#allocation2] sm:$0xff]  ;;  %s3183_s30 = sld [smem:[#allocation15_spill]] }
  0x3d   :  { %2086 = vmatprep.mubr.msk.f32.mxu0 %vm121_vm0, %v2744_v5  ;;  %v2766_v16 = vld [vmem:[#allocation2 + $0x8] sm:$0xff]  ;;  %s3184_s6 = sld [smem:[#allocation17_spill]]  ;;  %s3185_s3 = sld [smem:[#allocation14_spill]]  ;;  %vm220_vm1 = vcmask 523264   ;;  %v494_v59 = vld [vmem:[%s3147_s10] sm:$0xff]  ;;  %vm503_vm2 = vcmask 130048  }
  0x3e   :  { %s3186_s28 = sld [smem:[#allocation19_spill]]  ;;  %s3187_s29 = sld [smem:[#allocation16_spill]]  ;;  %v495_v60 = vld [vmem:[%s3147_s10 + $0x8] sm:$0xff]  ;;  %v1919_v62 = vld [vmem:[%s3146_s9] ss:$0 sm:$0xff]  ;;  %vm1705_vm3 = vcmask 31744  }
  0x3f   :  { %v2351_v61 = vpack.c.bf16 %v495_v60, %v494_v59  ;;  %vm1878_vm4 = vcmask 392192   ;;  %vm1881_vm5 = vcmask 424960   ;;  %vm1884_vm6 = vcmask 457728  }
  0x40   :  { %vm1887_vm7 = vcmask 490496  }
  0x42   :  { %v110_v0 = vld [vmem:[%s3182_s1] sm:$0xff]  ;;  %v111_v1 = vld [vmem:[%s3182_s1 + $0x8] sm:$0xff]  ;;  %v112_v2 = vld [vmem:[%s3182_s1 + $0x10] sm:$0xff] }
  0x43   :  { %v2303_v3 = vpack.c.bf16 %v111_v1, %v110_v0  ;;  %v113_v4 = vld [vmem:[%s3182_s1 + $0x18] sm:$0xff]  ;;  %v205_v7 = vld [vmem:[%s3183_s30] sm:$0xff]  ;;  %v206_v8 = vld [vmem:[%s3183_s30 + $0x8] sm:$0xff]  ;;  %s3188_s1 = sld [smem:[#allocation18_spill]] }
  0x44   :  { %v2307_v6 = vpack.c.bf16 %v113_v4, %v112_v2  ;;  %v207_v9 = vld [vmem:[%s3183_s30 + $0x10] sm:$0xff]  ;;  %v2311_v10 = vpack.c.bf16 %v206_v8, %v205_v7  ;;  %v208_v11 = vld [vmem:[%s3183_s30 + $0x18] sm:$0xff]  ;;  %v209_v13 = vld [vmem:[%s3183_s30 + $0x20] sm:$0xff] }
  0x45   :  { %2304 = vmatprep.subr.bf16.mxu0 %v2303_v3  ;;  %v2315_v12 = vpack.c.bf16 %v208_v11, %v207_v9  ;;  %v210_v14 = vld [vmem:[%s3183_s30 + $0x28] sm:$0xff]  ;;  %v211_v17 = vld [vmem:[%s3183_s30 + $0x30] sm:$0xff]  ;;  %v212_v18 = vld [vmem:[%s3183_s30 + $0x38] sm:$0xff] }
  0x46   :  { %2306 = vmatpush3.bf16.msra.mxu0 %v2303_v3  ;;  %2312 = vmatprep.subr.bf16.mxu1 %v2311_v10  ;;  %v2319_v15 = vpack.c.bf16 %v210_v14, %v209_v13  ;;  %v2323_v19 = vpack.c.bf16 %v212_v18, %v211_v17  ;;  %v304_v20 = vld [vmem:[%s3184_s6] sm:$0xff]  ;;  %v305_v21 = vld [vmem:[%s3184_s6 + $0x8] sm:$0xff]  ;;  %v306_v22 = vld [vmem:[%s3184_s6 + $0x10] sm:$0xff] }
  0x47   :  { %2308 = vmatprep.subr.bf16.mxu0 %v2307_v6  ;;  %2314 = vmatpush3.bf16.msra.mxu1 %v2311_v10  ;;  %v2327_v23 = vpack.c.bf16 %v305_v21, %v304_v20  ;;  %v307_v24 = vld [vmem:[%s3184_s6 + $0x18] sm:$0xff]  ;;  %v308_v26 = vld [vmem:[%s3184_s6 + $0x20] sm:$0xff]  ;;  %v309_v27 = vld [vmem:[%s3184_s6 + $0x28] sm:$0xff] }
  0x48   :  { %2316 = vmatprep.subr.bf16.mxu1 %v2315_v12  ;;  %v2331_v25 = vpack.c.bf16 %v307_v24, %v306_v22  ;;  %v2335_v28 = vpack.c.bf16 %v309_v27, %v308_v26  ;;  %v1910_v29 = vld [vmem:[%s3185_s3] ss:$0 sm:$0xff]  ;;  %v310_v36 = vld [vmem:[%s3184_s6 + $0x30] sm:$0xff]  ;;  %v311_v37 = vld [vmem:[%s3184_s6 + $0x38] sm:$0xff] }
  0x49   :  { %v2339_v38 = vpack.c.bf16 %v311_v37, %v310_v36  ;;  %v402_v39 = vld [vmem:[%s3186_s28] sm:$0xff]  ;;  %v403_v40 = vld [vmem:[%s3186_s28 + $0x8] sm:$0xff]  ;;  %v404_v49 = vld [vmem:[%s3186_s28 + $0x10] sm:$0xff] }
  0x4a   :  { %2310 = vmatpush3.bf16.msra.mxu0 %v2307_v6  ;;  %v2343_v41 = vpack.c.bf16 %v403_v40, %v402_v39  ;;  %v1913_v42 = vld [vmem:[%s3187_s29] ss:$0 sm:$0xff]  ;;  %v405_v50 = vld [vmem:[%s3186_s28 + $0x18] sm:$0xff]  ;;  %v588_v9 = vld [vmem:[%s3149_s12 + $0x8] sm:$0xff] }
  0x4b   :  { %2318 = vmatpush3.bf16.msra.mxu1 %v2315_v12  ;;  %2328 = vmatprep.subr.bf16.mxu0 %v2327_v23  ;;  %v2347_v51 = vpack.c.bf16 %v405_v50, %v404_v49  ;;  %v1916_v52 = vld [vmem:[%s3188_s1] ss:$0 sm:$0xff]  ;;  %v589_v11 = vld [vmem:[%s3149_s12 + $0x10] sm:$0xff]  ;;  %v590_v12 = vld [vmem:[%s3149_s12 + $0x18] sm:$0xff]  ;;  %s2575_s1 = smov 56  }
  0x4c   :  { %2320 = vmatprep.subr.bf16.mxu1 %v2319_v15  ;;  %v587_v8 = vld [vmem:[%s3149_s12] sm:$0xff]  ;;  %v2359_v13 = vpack.c.bf16 %v590_v12, %v589_v11  ;;  %v683_v17 = vld [vmem:[%s3151_s14 + $0x10] sm:$0xff]  ;;  %v686_v22 = vld [vmem:[%s3151_s14 + $0x28] sm:$0xff] }
  0x4d   :  { %2087 = vmatmul.mubr.msk.f32.vlgmr.msra.gmra.mrb[0].mxu0 %vm121_vm0, %v2766_v16  ;;  %v2355_v10 = vpack.c.bf16 %v588_v9, %v587_v8  ;;  %v681_v14 = vld [vmem:[%s3151_s14] sm:$0xff]  ;;  %v688_v36 = vld [vmem:[%s3151_s14 + $0x38] sm:$0xff]  ;;  %v876_v39 = vld [vmem:[%s3155_s18 + $0x8] sm:$0xff] }
  0x4e   :  { %2330 = vmatpush3.bf16.msra.mxu0 %v2327_v23  ;;  %v685_v21 = vld [vmem:[%s3151_s14 + $0x20] sm:$0xff]  ;;  %v782_v49 = vld [vmem:[%s3153_s16 + $0x18] sm:$0xff] }
  0x4f   :  { %2322 = vmatpush3.bf16.msra.mxu1 %v2319_v15  ;;  %2332 = vmatprep.subr.bf16.mxu0 %v2331_v25  ;;  %v682_v15 = vld [vmem:[%s3151_s14 + $0x8] sm:$0xff]  ;;  %v2371_v23 = vpack.c.bf16 %v686_v22, %v685_v21  ;;  %v1922_v24 = vld [vmem:[%s3148_s11] ss:$0 sm:$0xff]  ;;  %v786_v8 = vld [vmem:[%s3153_s16 + $0x38] sm:$0xff] }
  0x50   :  { %2324 = vmatprep.subr.bf16.mxu1 %v2323_v19  ;;  %v2363_v18 = vpack.c.bf16 %v682_v15, %v681_v14  ;;  %v2969_v15 = vld [vmem:[#allocation5] sm:$0xff]  ;;  %v1041_v21 = vld [vmem:[%s3156_s19] sm:$0xff]  ;;  %v1042_v22 = vld [vmem:[%s3156_s19 + $0x8] sm:$0xff] }
  0x52   :  { %2334 = vmatpush3.bf16.msra.mxu0 %v2331_v25 }
  0x53   :  { %2326 = vmatpush3.bf16.msra.mxu1 %v2323_v19  ;;  %2336 = vmatprep.subr.bf16.mxu0 %v2335_v28  ;;  %v684_v19 = vld [vmem:[%s3151_s14 + $0x18] sm:$0xff] }
  0x54   :  { %2344 = vmatprep.subr.bf16.mxu1 %v2343_v41  ;;  %v2367_v20 = vpack.c.bf16 %v684_v19, %v683_v17 }
  0x56   :  { %2338 = vmatpush3.bf16.msra.mxu0 %v2335_v28 }
  0x57   :  { %2340 = vmatprep.subr.bf16.mxu0 %v2339_v38 }
  0x5a   :  { %2342 = vmatpush3.bf16.msra.mxu0 %v2339_v38  ;;  %v875_v38 = vld [vmem:[%s3155_s18] sm:$0xff] }
  0x5b   :  { %2352 = vmatprep.subr.bf16.mxu0 %v2351_v61  ;;  %v2395_v40 = vpack.c.bf16 %v876_v39, %v875_v38 }
 0x120   :  { %v2088_v30 = vpop.f32.mrb[0].mxu0 }
 0x121   :  { %v2797_v31 = vadd.f32 %v2088_v30, %v1910_v29  ;;  %v194_v32 = vpop.f32.mrb[1].mxu0 }
 0x122   :  { %v2799_v33 = vadd.f32 %v1910_v29, %v194_v32  ;;  %v687_v32 = vld [vmem:[%s3151_s14 + $0x30] sm:$0xff] }
 0x123   :  { %v204_v35 = vmax.f32 %v2797_v31, 0.0  ;;  %v2375_v37 = vpack.c.bf16 %v688_v36, %v687_v32  ;;  %v1048_v32 = vld [vmem:[%s3156_s19 + $0x38] sm:$0xff]  ;;  %v1212_v31 = vld [vmem:[%s3157_s20 + $0x8] sm:$0xff] }
 0x124   :  { %v203_v34 = vmax.f32 %v2799_v33, 0.0 }
 0x126   :  { %2105 = vmatprep.mubr.msk.f32.mxu1 %vm220_vm1, %v203_v34 }
 0x127   :  { %2106 = vmatmul.mubr.msk.f32.vlgmr.msra.gmra.mrb[0].mxu1 %vm220_vm1, %v204_v35 }
 0x128   :  { %2346 = vmatpush3.bf16.msra.mxu1 %v2343_v41  ;;  %v779_v41 = vld [vmem:[%s3153_s16] sm:$0xff] }
 0x129   :  { %2348 = vmatprep.subr.bf16.mxu1 %v2347_v51 }
 0x12c   :  { %2350 = vmatpush3.bf16.msra.mxu1 %v2347_v51  ;;  %v783_v51 = vld [vmem:[%s3153_s16 + $0x20] sm:$0xff] }
 0x12d   :  { %2356 = vmatprep.subr.bf16.mxu1 %v2355_v10 }
 0x1fa   :  { %v2107_v43 = vpop.f32.mrb[0].mxu1 }
 0x1fb   :  { %v2824_v44 = vadd.f32 %v2107_v43, %v1913_v42  ;;  %v293_v45 = vpop.f32.mrb[1].mxu1  ;;  %v781_v43 = vld [vmem:[%s3153_s16 + $0x10] sm:$0xff] }
 0x1fc   :  { %v2826_v46 = vadd.f32 %v1913_v42, %v293_v45  ;;  %v780_v42 = vld [vmem:[%s3153_s16 + $0x8] sm:$0xff]  ;;  %v2383_v50 = vpack.c.bf16 %v782_v49, %v781_v43 }
 0x1fd   :  { %v303_v48 = vmax.f32 %v2824_v44, 0.0  ;;  %v2379_v45 = vpack.c.bf16 %v780_v42, %v779_v41  ;;  %v1381_v44 = vld [vmem:[%s3158_s21] sm:$0xff] }
 0x1fe   :  { %v302_v47 = vmax.f32 %v2826_v46, 0.0  ;;  %v1382_v46 = vld [vmem:[%s3158_s21 + $0x8] sm:$0xff] }
 0x200   :  { %2124 = vmatprep.mubr.msk.f32.mxu0 %vm220_vm1, %v302_v47 }
 0x201   :  { %2125 = vmatmul.mubr.msk.f32.vlgmr.msra.gmra.mrb[2].mxu0 %vm220_vm1, %v303_v48 }
 0x202   :  { %2354 = vmatpush3.bf16.msra.mxu0 %v2351_v61 }
 0x203   :  { %2364 = vmatprep.subr.bf16.mxu0 %v2363_v18 }
 0x2d4   :  { %v2126_v53 = vpop.f32.mrb[2].mxu0 }
 0x2d5   :  { %v2845_v54 = vadd.f32 %v2126_v53, %v1916_v52  ;;  %v391_v55 = vpop.f32.mrb[3].mxu0 }
 0x2d6   :  { %v2847_v56 = vadd.f32 %v1916_v52, %v391_v55  ;;  %v784_v52 = vld [vmem:[%s3153_s16 + $0x28] sm:$0xff]  ;;  %v1925_v55 = vld [vmem:[%s3150_s13] ss:$0 sm:$0xff] }
 0x2d7   :  { %v401_v58 = vmax.f32 %v2845_v54, 0.0  ;;  %v2387_v53 = vpack.c.bf16 %v784_v52, %v783_v51  ;;  %v1211_v51 = vld [vmem:[%s3157_s20] sm:$0xff] }
 0x2d8   :  { %v400_v57 = vmax.f32 %v2847_v56, 0.0  ;;  %v2427_v52 = vpack.c.bf16 %v1212_v31, %v1211_v51  ;;  %v1547_v54 = vld [vmem:[%s3159_s22] sm:$0xff]  ;;  %v1548_v56 = vld [vmem:[%s3159_s22 + $0x8] sm:$0xff]  ;;  %s2572_s22 = smov 32  }
 0x2da   :  { %2135 = vmatprep.mubr.msk.f32.mxu1 %vm121_vm0, %v400_v57 }
 0x2db   :  { %2136 = vmatmul.mubr.msk.f32.vlgmr.msra.gmra.mrb[2].mxu1 %vm121_vm0, %v401_v58 }
 0x2dc   :  { %2358 = vmatpush3.bf16.msra.mxu1 %v2355_v10 }
 0x2dd   :  { %2360 = vmatprep.subr.bf16.mxu1 %v2359_v13 }
 0x2e0   :  { %2362 = vmatpush3.bf16.msra.mxu1 %v2359_v13 }
 0x2e1   :  { %2380 = vmatprep.subr.bf16.mxu1 %v2379_v45 }
 0x3ae   :  { %v2137_v63 = vpop.f32.mrb[2].mxu1 }
 0x3af   :  { %v485_v0 = vpop.f32.mrb[3].mxu1  ;;  %v2866_v1 = vadd.f32 %v2137_v63, %v1919_v62  ;;  %v877_v63 = vld [vmem:[%s3155_s18 + $0x10] sm:$0xff] }
 0x3b0   :  { %v2868_v2 = vadd.f32 %v1919_v62, %v485_v0  ;;  %v878_v0 = vld [vmem:[%s3155_s18 + $0x18] sm:$0xff]  ;;  %s2574_s18 = smov 52  }
 0x3b1   :  { %v1731_v6 = vmul.f32 %v2866_v1, %v2866_v1 }
 0x3b2   :  { %2142 = vmatprep.mubr.msk.f32.mxu0 %vm503_vm2, %v2868_v2  ;;  %v1730_v3 = vmul.f32 %v2868_v2, %v2868_v2 }
 0x3b3   :  { %2143 = vmatmul.mubr.msk.f32.vlgmr.msra.gmra.mrb[4].mxu0 %vm503_vm2, %v2866_v1  ;;  %v1735_v7 = vsel %vm503_vm2, %v1731_v6, 0.0  ;;  %v2399_v6 = vpack.c.bf16 %v878_v0, %v877_v63  ;;  %v1217_v63 = vld [vmem:[%s3157_s20 + $0x30] sm:$0xff]  ;;  %v1218_v0 = vld [vmem:[%s3157_s20 + $0x38] sm:$0xff] }
 0x3b4   :  { %v1732_v4 = vsel %vm503_vm2, %v1730_v3, 0.0  ;;  %2366 = vmatpush3.bf16.msra.mxu0 %v2363_v18 }
 0x3b5   :  { %1733 = vadd.xlane.f32.xlu0 %v1732_v4  ;;  %2368 = vmatprep.subr.bf16.mxu0 %v2367_v20 }
 0x3b8   :  { %2370 = vmatpush3.bf16.msra.mxu0 %v2367_v20  ;;  %v2975_v20 = vld [vmem:[#allocation5 + $0x8] sm:$0xff] }
 0x3b9   :  { %1736 = vadd.xlane.f32.xlu0 %v1735_v7  ;;  %2372 = vmatprep.subr.bf16.mxu0 %v2371_v23  ;;  %v785_v7 = vld [vmem:[%s3153_s16 + $0x30] sm:$0xff]  ;;  %s2576_s16 = smov [#allocation7]  }
 0x3ba   :  { %v2391_v9 = vpack.c.bf16 %v786_v8, %v785_v7  ;;  %s1897_s28 = sshll.u32 %s2576_s16, 4  ;;  %s1898_s28 = int_to_ptr.vmem [resolvable:$true] %s1897_s28 }
 0x3bb   :  { %s2540_s30 = scalar_lea.vmem %s1898_s28, 256  ;;  %p2545_p3 = scmp.lt.s32.totalorder %s1898_s28, %s1898_s28 }
 0x3bc   :  { %2374 = vmatpush3.bf16.msra.mxu0 %v2371_v23  ;;  %v2407_v23 = vpack.c.bf16 %v1042_v22, %v1041_v21  ;;  %p2541_p2 = scmp.ne.s32.totalorder %s1898_s28, %s2540_s30  ;;  %p2546_p4 = scmp.lt.s32.totalorder %s2540_s30, %s2540_s30 }
 0x3bd   :  { %2376 = vmatprep.subr.bf16.mxu0 %v2375_v37 }
 0x3be   :  { %p2547_p5 = por %p2546_p4, %p2545_p3 }
 0x3c0   :  { %2378 = vmatpush3.bf16.msra.mxu0 %v2375_v37  ;;  %p2548_p6 = pnand %p2547_p5, %p2541_p2 }
 0x3c1   :  { %2396 = vmatprep.subr.bf16.mxu0 %v2395_v40 }
 0x486   :  { %v2144_v25 = vpop.f32.mrb[4].mxu0 }
 0x487   :  { %v582_v26 = vadd.f32 %v2144_v25, %v1922_v24  ;;  %v576_v27 = vpop.f32.mrb[5].mxu0  ;;  %v1044_v25 = vld [vmem:[%s3156_s19 + $0x18] sm:$0xff] }
 0x488   :  { %v577_v28 = vadd.f32 %v1922_v24, %v576_v27  ;;  %v1043_v24 = vld [vmem:[%s3156_s19 + $0x10] sm:$0xff]  ;;  %v1045_v27 = vld [vmem:[%s3156_s19 + $0x20] sm:$0xff] }
 0x489   :  { %v586_v30 = vmax.f32 %v582_v26, 0.0  ;;  %v2411_v26 = vpack.c.bf16 %v1044_v25, %v1043_v24 }
 0x48a   :  { %v585_v29 = vmax.f32 %v577_v28, 0.0  ;;  %v1046_v28 = vld [vmem:[%s3156_s19 + $0x28] sm:$0xff] }
 0x48c   :  { %2153 = vmatprep.mubr.msk.f32.mxu1 %vm121_vm0, %v585_v29  ;;  %v2415_v29 = vpack.c.bf16 %v1046_v28, %v1045_v27 }
 0x48d   :  { %2154 = vmatmul.mubr.msk.f32.vlgmr.msra.gmra.mrb[4].mxu1 %vm121_vm0, %v586_v30  ;;  %v1047_v30 = vld [vmem:[%s3156_s19 + $0x30] sm:$0xff] }
 0x48e   :  { %2382 = vmatpush3.bf16.msra.mxu1 %v2379_v45  ;;  %v2419_v36 = vpack.c.bf16 %v1048_v32, %v1047_v30 }
 0x48f   :  { %2384 = vmatprep.subr.bf16.mxu1 %v2383_v50 }
 0x492   :  { %2386 = vmatpush3.bf16.msra.mxu1 %v2383_v50 }
 0x493   :  { %2388 = vmatprep.subr.bf16.mxu1 %v2387_v53 }
 0x496   :  { %2390 = vmatpush3.bf16.msra.mxu1 %v2387_v53  ;;  %v1213_v53 = vld [vmem:[%s3157_s20 + $0x10] sm:$0xff] }
 0x497   :  { %2392 = vmatprep.subr.bf16.mxu1 %v2391_v9 }
 0x49a   :  { %2394 = vmatpush3.bf16.msra.mxu1 %v2391_v9 }
 0x560   :  { %v2155_v59 = vpop.f32.mrb[4].mxu1 }
 0x561   :  { %v676_v60 = vadd.f32 %v2155_v59, %v1925_v55  ;;  %v670_v61 = vpop.f32.mrb[5].mxu1 }
 0x562   :  { %v671_v62 = vadd.f32 %v1925_v55, %v670_v61  ;;  %v1214_v55 = vld [vmem:[%s3157_s20 + $0x18] sm:$0xff]  ;;  %v1216_v61 = vld [vmem:[%s3157_s20 + $0x28] sm:$0xff] }
 0x563   :  { %v680_v4 = vmax.f32 %v676_v60, 0.0  ;;  %v2431_v59 = vpack.c.bf16 %v1214_v55, %v1213_v53  ;;  %v1215_v60 = vld [vmem:[%s3157_s20 + $0x20] sm:$0xff] }
 0x564   :  { %v679_v3 = vmax.f32 %v671_v62, 0.0  ;;  %v2435_v62 = vpack.c.bf16 %v1216_v61, %v1215_v60 }
 0x566   :  { %2172 = vmatprep.mubr.msk.f32.mxu0 %vm220_vm1, %v679_v3  ;;  %v2439_v3 = vpack.c.bf16 %v1218_v0, %v1217_v63 }
 0x567   :  { %2173 = vmatmul.mubr.msk.f32.vlgmr.msra.gmra.mrb[6].mxu0 %vm220_vm1, %v680_v4 }
 0x568   :  { %2398 = vmatpush3.bf16.msra.mxu0 %v2395_v40  ;;  %2202 = vmatprep.mubr.msk.f32.mxu0 %vm121_vm0, %v2744_v5  ;;  %v1928_v5 = vld [vmem:[%s3152_s15] ss:$0 sm:$0xff]  ;;  %s3189_s15 = sld [smem:[#allocation20_spill]] }
 0x569   :  { %2400 = vmatprep.subr.bf16.mxu0 %v2399_v6 }
 0x56c   :  { %2402 = vmatpush3.bf16.msra.mxu0 %v2399_v6 }
 0x56d   :  { %2408 = vmatprep.subr.bf16.mxu0 %v2407_v23 }
 0x56f   :  { %2203 = vmatmul.mubr.msk.f32.vlgmr.msra.gmra.mrb[8].mxu0 %vm121_vm0, %v2766_v16 }
 0x570   :  { %2410 = vmatpush3.bf16.msra.mxu0 %v2407_v23 }
 0x571   :  { %2412 = vmatprep.subr.bf16.mxu0 %v2411_v26 }
 0x574   :  { %2414 = vmatpush3.bf16.msra.mxu0 %v2411_v26 }
 0x575   :  { %2416 = vmatprep.subr.bf16.mxu0 %v2415_v29 }
 0x578   :  { %2418 = vmatpush3.bf16.msra.mxu0 %v2415_v29 }
 0x579   :  { %2420 = vmatprep.subr.bf16.mxu0 %v2419_v36 }
 0x57c   :  { %2422 = vmatpush3.bf16.msra.mxu0 %v2419_v36 }
 0x63a   :  { %v2174_v10 = vpop.f32.mrb[6].mxu0 }
 0x63b   :  { %v774_v11 = vadd.f32 %v2174_v10, %v1928_v5  ;;  %v768_v12 = vpop.f32.mrb[7].mxu0 }
 0x63c   :  { %v769_v13 = vadd.f32 %v1928_v5, %v768_v12 }
 0x63d   :  { %v778_v14 = vmax.f32 %v774_v11, 0.0 }
 0x63e   :  { %v777_v16 = vmax.f32 %v769_v13, 0.0 }
 0x640   :  { %2191 = vmatprep.mubr.msk.f32.mxu1 %vm220_vm1, %v777_v16 }
 0x641   :  { %2192 = vmatmul.mubr.msk.f32.vlgmr.msra.gmra.mrb[6].mxu1 %vm220_vm1, %v778_v14  ;;  %v1384_v14 = vld [vmem:[%s3158_s21 + $0x18] sm:$0xff] }
 0x642   :  { %v2204_v17 = vpop.f32.mrb[8].mxu0  ;;  %2209 = vmatprep.mubr.msk.f32.mxu1 %vm503_vm2, %v2969_v15 }
 0x643   :  { %v945_v18 = vpop.f32.mrb[9].mxu0 }
 0x644   :  { %v2403_v19 = vpack.c.bf16 %v2204_v17, %v945_v18 }
 0x646   :  { %2404 = vmatprep.subr.bf16.mxu1 %v2403_v19 }
 0x647   :  { %2406 = vmatpush3.bf16.msra.mxu1 %v2403_v19 }
 0x64a   :  { %2210 = vmatmul.mubr.msk.f32.vlgmr.msra.gmra.mrb[8].mxu1 %vm503_vm2, %v2975_v20 }
 0x64b   :  { %2235 = vmatprep.mubr.msk.f32.mxu1 %vm503_vm2, %v2969_v15 }
 0x714   :  { %v3005_v37 = vpop.f32.mrb[6].mxu1 }
 0x715   :  { %v3007_v38 = vpop.f32.mrb[7].mxu1 }
 0x71d   :  { %v2211_v39 = vpop.f32.mrb[8].mxu1 }
 0x71e   :  { %v1036_v40 = vmax.f32 %v2211_v39, 0.0  ;;  %v1026_v41 = vpop.f32.mrb[9].mxu1 }
 0x71f   :  { %v1035_v42 = vmax.f32 %v1026_v41, 0.0 }
 0x720   :  { %v1038_v43 = vadd.f32 %v1036_v40, %v204_v35 }
 0x721   :  { %v1037_v45 = vadd.f32 %v1035_v42, %v203_v34 }
 0x722   :  { %v1040_v50 = vmul.f32 0.5, %v1038_v43 }
 0x723   :  { %v1039_v49 = vmul.f32 0.5, %v1037_v45 }
 0x725   :  { %2228 = vmatprep.mubr.msk.f32.mxu0 %vm220_vm1, %v1039_v49 }
 0x726   :  { %2229 = vmatmul.mubr.msk.f32.vlgmr.msra.gmra.mrb[10].mxu0 %vm220_vm1, %v1040_v50 }
 0x727   :  { %2261 = vmatprep.mubr.msk.f32.mxu0 %vm503_vm2, %v2969_v15 }
 0x7f9   :  { %v2230_v35 = vpop.f32.mrb[10].mxu0 }
 0x7fa   :  { %v1121_v33 = vpop.f32.mrb[11].mxu0 }
 0x7fb   :  { %v2423_v34 = vpack.c.bf16 %v2230_v35, %v1121_v33 }
 0x7fd   :  { %2424 = vmatprep.subr.bf16.mxu1 %v2423_v34 }
 0x7fe   :  { %2426 = vmatpush3.bf16.msra.mxu1 %v2423_v34 }
 0x7ff   :  { %2428 = vmatprep.subr.bf16.mxu1 %v2427_v52 }
 0x801   :  { %2236 = vmatmul.mubr.msk.f32.vlgmr.msra.gmra.mrb[10].mxu1 %vm503_vm2, %v2975_v20 }
 0x802   :  { %2430 = vmatpush3.bf16.msra.mxu1 %v2427_v52 }
 0x803   :  { %2432 = vmatprep.subr.bf16.mxu1 %v2431_v59 }
 0x806   :  { %2434 = vmatpush3.bf16.msra.mxu1 %v2431_v59 }
 0x807   :  { %2436 = vmatprep.subr.bf16.mxu1 %v2435_v62 }
 0x80a   :  { %2438 = vmatpush3.bf16.msra.mxu1 %v2435_v62 }
 0x80b   :  { %2440 = vmatprep.subr.bf16.mxu1 %v2439_v3 }
 0x80e   :  { %2442 = vmatpush3.bf16.msra.mxu1 %v2439_v3 }
 0x8d4   :  { %v2237_v4 = vpop.f32.mrb[10].mxu1 }
 0x8d5   :  { %v1206_v6 = vmax.f32 %v2237_v4, 0.0  ;;  %v1196_v7 = vpop.f32.mrb[11].mxu1 }
 0x8d6   :  { %v1205_v8 = vmax.f32 %v1196_v7, 0.0 }
 0x8d7   :  { %v1208_v9 = vadd.f32 %v1206_v6, %v303_v48  ;;  %v1383_v48 = vld [vmem:[%s3158_s21 + $0x10] sm:$0xff]  ;;  %v1734_v6 = vpop.xlane.xlu0 %1733 }
 0x8d8   :  { %v1207_v5 = vadd.f32 %v1205_v8, %v302_v47  ;;  %v2447_v47 = vpack.c.bf16 %v1382_v46, %v1381_v44  ;;  %v2451_v17 = vpack.c.bf16 %v1384_v14, %v1383_v48 }
 0x8d9   :  { %v1210_v11 = vmul.f32 0.5, %v1208_v9 }
 0x8da   :  { %v1209_v10 = vmul.f32 0.5, %v1207_v5 }
 0x8db   :  { %v1737_v5 = vpop.xlane.xlu0 %1736 }
 0x8dc   :  { %2254 = vmatprep.mubr.msk.f32.mxu1 %vm220_vm1, %v1209_v10 }
 0x8dd   :  { %2255 = vmatmul.mubr.msk.f32.vlgmr.msra.gmra.mrb[12].mxu1 %vm220_vm1, %v1210_v11 }
 0x8de   :  { %2279 = vmatprep.mubr.msk.f32.mxu1 %vm503_vm2, %v2969_v15 }
 0x9b0   :  { %v2256_v12 = vpop.f32.mrb[12].mxu1 }
 0x9b1   :  { %v1291_v13 = vpop.f32.mrb[13].mxu1 }
 0x9b2   :  { %v2443_v16 = vpack.c.bf16 %v2256_v12, %v1291_v13 }
 0x9b4   :  { %2444 = vmatprep.subr.bf16.mxu0 %v2443_v16 }
 0x9b5   :  { %2446 = vmatpush3.bf16.msra.mxu0 %v2443_v16 }
 0x9b6   :  { %2448 = vmatprep.subr.bf16.mxu0 %v2447_v47 }
 0x9b8   :  { %2262 = vmatmul.mubr.msk.f32.vlgmr.msra.gmra.mrb[12].mxu0 %vm503_vm2, %v2975_v20 }
 0x9b9   :  { %2450 = vmatpush3.bf16.msra.mxu0 %v2447_v47 }
 0x9ba   :  { %2452 = vmatprep.subr.bf16.mxu0 %v2451_v17 }
 0x9bd   :  { %2454 = vmatpush3.bf16.msra.mxu0 %v2451_v17 }
 0xa8b   :  { %v2263_v18 = vpop.f32.mrb[12].mxu0 }
 0xa8c   :  { %v1376_v19 = vmax.f32 %v2263_v18, 0.0  ;;  %v1366_v21 = vpop.f32.mrb[13].mxu0 }
 0xa8d   :  { %v1375_v22 = vmax.f32 %v1366_v21, 0.0 }
 0xa8e   :  { %v1378_v23 = vadd.f32 %v1376_v19, %v401_v58  ;;  %v1728_v58 = vld [vmem:[%s3160_s23] sm:$0xff] }
 0xa8f   :  { %v1377_v24 = vadd.f32 %v1375_v22, %v400_v57  ;;  %v2459_v57 = vpack.c.bf16 %v1548_v56, %v1547_v54  ;;  %v1738_v55 = vmul.f32 %v1728_v58, %v1728_v58 }
 0xa90   :  { %v1380_v26 = vmul.f32 0.5, %v1378_v23 }
 0xa91   :  { %v1379_v25 = vmul.f32 0.5, %v1377_v24  ;;  %v1740_v60 = vsel %vm1705_vm3, %v1738_v55, 0.0 }
 0xa93   :  { %2272 = vmatprep.mubr.msk.f32.mxu0 %vm121_vm0, %v1379_v25 }
 0xa94   :  { %2273 = vmatmul.mubr.msk.f32.vlgmr.msra.gmra.mrb[14].mxu0 %vm121_vm0, %v1380_v26 }
 0xa95   :  { %2293 = vmatprep.mubr.msk.f32.mxu0 %vm503_vm2, %v2969_v15  ;;  %v1729_v15 = vld [vmem:[%s3160_s23 + $0x8] sm:$0xff]  ;;  %s2573_s23 = smov 48  }
 0xa96   :  { %v2467_v30 = vpack.c.bf16 %v1729_v15, %v1728_v58  ;;  %v1739_v59 = vmul.f32 %v1729_v15, %v1729_v15 }
 0xa98   :  { %v1741_v61 = vsel %vm1705_vm3, %v1739_v59, 0.0 }
 0xa99   :  { %v1742_v62 = vadd.f32 %v1741_v61, %v1740_v60 }
 0xa9b   :  { %v1743_v63 = vrot.slane %v1742_v62, 4 }
 0xa9d   :  { %v1744_v0 = vadd.f32 %v1743_v63, %v1742_v62 }
 0xa9f   :  { %v1745_v3 = vrot.slane %v1744_v0, 2 }
 0xb67   :  { %v2274_v27 = vpop.f32.mrb[14].mxu0 }
 0xb68   :  { %v1457_v28 = vpop.f32.mrb[15].mxu0 }
 0xb69   :  { %v2455_v29 = vpack.c.bf16 %v2274_v27, %v1457_v28 }
 0xb6b   :  { %2456 = vmatprep.subr.bf16.mxu1 %v2455_v29 }
 0xb6c   :  { %2458 = vmatpush3.bf16.msra.mxu1 %v2455_v29 }
 0xb6d   :  { %2460 = vmatprep.subr.bf16.mxu1 %v2459_v57 }
 0xb6f   :  { %2280 = vmatmul.mubr.msk.f32.vlgmr.msra.gmra.mrb[14].mxu1 %vm503_vm2, %v2975_v20 }
 0xb70   :  { %2462 = vmatpush3.bf16.msra.mxu1 %v2459_v57 }
 0xb71   :  { %2468 = vmatprep.subr.bf16.mxu1 %v2467_v30 }
 0xc42   :  { %v2281_v32 = vpop.f32.mrb[14].mxu1 }
 0xc43   :  { %v1542_v36 = vmax.f32 %v2281_v32, 0.0  ;;  %v1532_v39 = vpop.f32.mrb[15].mxu1 }
 0xc44   :  { %v1541_v40 = vmax.f32 %v1532_v39, 0.0 }
 0xc45   :  { %v1544_v41 = vadd.f32 %v1542_v36, %v2866_v1 }
 0xc46   :  { %v1543_v42 = vadd.f32 %v1541_v40, %v2868_v2 }
 0xc47   :  { %v1546_v45 = vmul.f32 0.5, %v1544_v41 }
 0xc48   :  { %v1545_v43 = vmul.f32 0.5, %v1543_v42 }
 0xc4a   :  { %2286 = vmatprep.mubr.msk.f32.mxu1 %vm503_vm2, %v1545_v43 }
 0xc4b   :  { %2287 = vmatmul.mubr.msk.f32.vlgmr.msra.gmra.mrb[16].mxu1 %vm503_vm2, %v1546_v45  ;;  %v1931_v45 = vld [vmem:[%s3189_s15] ss:$0 sm:$0xff] }
 0xc4c   :  { %2470 = vmatpush3.bf16.msra.mxu1 %v2467_v30  ;;  %2300 = vmatprep.mubr.msk.f32.mxu1 %vm503_vm2, %v2868_v2 }
 0xc4f   :  { %2301 = vmatmul.mubr.msk.f32.vlgmr.msra.gmra.mrb[18].mxu1 %vm503_vm2, %v2866_v1 }
 0xd1e   :  { %v2288_v49 = vpop.f32.mrb[16].mxu1 }
 0xd1f   :  { %v1621_v50 = vpop.f32.mrb[17].mxu1 }
 0xd20   :  { %v2463_v51 = vpack.c.bf16 %v2288_v49, %v1621_v50  ;;  %v867_v49 = vadd.f32 %v1931_v45, %v3007_v38 }
 0xd22   :  { %2464 = vmatprep.subr.bf16.mxu0 %v2463_v51  ;;  %v2302_v31 = vpop.f32.mrb[18].mxu1 }
 0xd23   :  { %2466 = vmatpush3.bf16.msra.mxu0 %v2463_v51  ;;  %v1815_v35 = vpop.f32.mrb[19].mxu1  ;;  %v1827_v10 = vmul.f32 2.0, %v2302_v31 }
 0xd24   :  { %v1826_v8 = vmul.f32 2.0, %v1815_v35 }
 0xd26   :  { %2294 = vmatmul.mubr.msk.f32.vlgmr.msra.gmra.mrb[16].mxu0 %vm503_vm2, %v2975_v20  ;;  %v1746_v20 = vadd.f32 %v1745_v3, %v1744_v0 }
 0xd28   :  { %v1747_v4 = vrot.slane %v1746_v20, 1 }
 0xd2a   :  { %v1748_v7 = vadd.f32 %v1747_v4, %v1746_v20 }
 0xd2c   :  { %v1824_v9 = vadd.f32 %v1748_v7, %v1734_v6  ;;  %v1825_v12 = vadd.f32 %v1748_v7, %v1737_v5 }
 0xd2e   :  { %v1828_v11 = vsub.f32 %v1824_v9, %v1826_v8  ;;  %v1829_v13 = vsub.f32 %v1825_v12, %v1827_v10 }
 0xd30   :  { %v1830_v16 = vmax.f32 %v1828_v11, 0.0  ;;  %v1831_v47 = vmax.f32 %v1829_v13, 0.0 }
 0xd32   :  { %v1832_v48 = vadd.f32 1.0, %v1830_v16  ;;  %v1833_v19 = vadd.f32 1.0, %v1831_v47 }
 0xdf9   :  { %v2295_v33 = vpop.f32.mrb[16].mxu0 }
 0xdfa   :  { %v1696_v34 = vpop.f32.mrb[17].mxu0  ;;  %v1709_v53 = vsel %vm1705_vm3, %v2295_v33, -inf }
 0xdfb   :  { %v1706_v52 = vsel %vm1705_vm3, %v1696_v34, -inf }
 0xdfc   :  { %1707 = vmax.xlane.f32.xlu1 %v1706_v52  ;;  %v872_v52 = vadd.f32 %v3005_v37, %v1931_v45 }
 0xe00   :  { %1710 = vmax.xlane.f32.xlu1 %v1709_v53 }
 0xe89   :  { %v1708_v44 = vpop.xlane.xlu1 %1707 }
 0xe8a   :  { %v1712_v46 = vsub.f32 %v1696_v34, %v1708_v44 }
 0xe8c   :  { %v1714_v14 = vmul.f32 1.442695, %v1712_v46 }
 0xe8d   :  { %v1711_v17 = vpop.xlane.xlu1 %1710 }
 0xe8e   :  { %2480 = vpow2.f32 %v1714_v14  ;;  %v1713_v18 = vsub.f32 %v2295_v33, %v1711_v17 }
 0xe8f   :  { %2482 = vrcp.f32 %v1832_v48 }
 0xe90   :  { %v1716_v21 = vmul.f32 1.442695, %v1713_v18 }
 0xe92   :  { %2484 = vpow2.f32 %v1716_v21 }
 0xe93   :  { %2486 = vrcp.f32 %v1833_v19 }
 0xe98   :  { %v2481_v22 = vpop.eup %2480 }
 0xe99   :  { %v1718_v23 = vsel %vm1705_vm3, %v2481_v22, 0.0  ;;  %v2483_v24 = vpop.eup %2482 }
 0xe9a   :  { %1719 = vadd.xlane.f32.xlu0 %v1718_v23  ;;  %v1836_v26 = vsel %vm1705_vm3, %v2483_v24, 0.0 }
 0xe9c   :  { %v2485_v25 = vpop.eup %2484 }
 0xe9d   :  { %v1721_v27 = vsel %vm1705_vm3, %v2485_v25, 0.0  ;;  %v2487_v28 = vpop.eup %2486 }
 0xe9e   :  { %1837 = vadd.xlane.f32.xlu0 %v1836_v26  ;;  %1722 = vadd.xlane.f32.xlu1 %v1721_v27  ;;  %v1839_v29 = vsel %vm1705_vm3, %v2487_v28, 0.0 }
 0xea2   :  { %1840 = vadd.xlane.f32.xlu1 %v1839_v29 }
 0xeb3   :  { %1848 = vrot.lane.b32.xlu1 %v2866_v1, %s2572_s22 }
 0xeb4   :  { %1846 = vrot.lane.b32.xlu0 %v2868_v2, %s2572_s22 }
 0xeb7   :  { %1854 = vrot.lane.b32.xlu1 %v1696_v34, %s2573_s23 }
 0xebb   :  { %1856 = vrot.lane.b32.xlu1 %v2295_v33, %s2573_s23 }
 0xf27   :  { %v1720_v54 = vpop.xlane.xlu0 %1719 }
 0xf28   :  { %2488 = vrcp.f32 %v1720_v54 }
 0xf2b   :  { %v1838_v56 = vpop.xlane.xlu0 %1837  ;;  %v1723_v57 = vpop.xlane.xlu1 %1722 }
 0xf2c   :  { %2490 = vrcp.f32 %v1838_v56 }
 0xf2d   :  { %2492 = vrcp.f32 %v1723_v57 }
 0xf2f   :  { %v1841_v58 = vpop.xlane.xlu1 %1840  ;;  %v1847_v43 = vpop.permute.xlu0 %1846 }
 0xf30   :  { %2494 = vrcp.f32 %v1841_v58  ;;  %v1876_v31 = vsel %vm121_vm0, %v867_v49, %v1847_v43 }
 0xf32   :  { %v2489_v15 = vpop.eup %2488 }
 0xf33   :  { %v1726_v30 = vmul.f32 %v2489_v15, %v2481_v22  ;;  %v1849_v41 = vpop.permute.xlu1 %1848 }
 0xf34   :  { %v1877_v59 = vsel %vm121_vm0, %v872_v52, %v1849_v41 }
 0xf35   :  { %1862 = vrot.lane.b32.xlu0 %v1726_v30, %s2574_s18 }
 0xf36   :  { %v2491_v32 = vpop.eup %2490 }
 0xf37   :  { %v2493_v36 = vpop.eup %2492  ;;  %v1844_v1 = vmul.f32 %v2491_v32, %v2483_v24  ;;  %v1855_v42 = vpop.permute.xlu1 %1854 }
 0xf38   :  { %v1727_v39 = vmul.f32 %v2493_v36, %v2485_v25  ;;  %v1879_v35 = vsel %vm1878_vm4, %v1876_v31, %v1855_v42 }
 0xf39   :  { %1870 = vrot.lane.b32.xlu0 %v1844_v1, %s2575_s1 }
 0xf3a   :  { %v2495_v2 = vpop.eup %2494  ;;  %1864 = vrot.lane.b32.xlu1 %v1727_v39, %s2574_s18 }
 0xf3b   :  { %v1845_v40 = vmul.f32 %v2495_v2, %v2487_v28  ;;  %v1857_v51 = vpop.permute.xlu1 %1856 }
 0xf3c   :  { %v1880_v60 = vsel %vm1878_vm4, %v1877_v59, %v1857_v51 }
 0xf3e   :  { %1872 = vrot.lane.b32.xlu1 %v1845_v40, %s2575_s1 }
 0xfa7   :  { %v1863_v50 = vpop.permute.xlu0 %1862 }
 0xfa8   :  { %v1882_v33 = vsel %vm1881_vm5, %v1879_v35, %v1863_v50 }
 0xfab   :  { %v1871_v34 = vpop.permute.xlu0 %1870 }
 0xfac   :  { %v1885_v53 = vsel %vm1884_vm6, %v1882_v33, %v1871_v34  ;;  %v1865_v55 = vpop.permute.xlu1 %1864 }
 0xfad   :  { %v1888_v38 = vsel %vm1887_vm7, %v1885_v53, 0.0  ;;  %v1883_v61 = vsel %vm1881_vm5, %v1880_v60, %v1865_v55 }
 0xfae   :  { %1890 = vst [vmem:[#allocation7] sm:$0xff] %v1888_v38 }
 0xfb0   :  { %v1873_v62 = vpop.permute.xlu1 %1872 }
 0xfb1   :  { %v1886_v63 = vsel %vm1884_vm6, %v1883_v61, %v1873_v62 }
 0xfb2   :  { %v1889_v37 = vsel %vm1887_vm7, %v1886_v63, 0.0 }
 0xfb3   :  { %1891 = vst [vmem:[#allocation7 + $0x8] sm:$0xff] %v1889_v37 }
 0xfb4   :  { %2551 = shalt.err (!%p2548_p6)
}
 0xfb5   :  { %s3190_s12 = sld [smem:[#allocation21_spill]] }
 0xfbb   :  { %s2552_s20 = scalar_lea.hbm %s3190_s12, 256 }
 0xfbc   :  { %p2553_p7 = scmp.ne.s32.totalorder %s3190_s12, %s2552_s20  ;;  %p2556_p8 = scmp.lt.u32.totalorder %s2552_s20, %s3190_s12 }
 0xfbe   :  { %p2558_p9 = pnand %p2556_p8, %p2553_p7 }
 0xfc0   :  { %2561 = shalt.err (!%p2558_p9)
}
 0xfc1   :  { %1903 = dma.vmem_to_hbm [thread:$0]  %s1898_s28, 256, %s3190_s12, [#allocation4], %s2569_s25, %s2569_s25, %s2570_s8  }
 0xfc2   :  { %2566 = dma.done.wait [#allocation4], 256  }
 0xfc3   :  { %2567 = vsyncadd [#allocation4], 4294967040 }
 0xfc4   :  { %1907 = vsyncpa [#allocation3], 1 }
 0xfc5   :  { %1908 = vsyncpa [#allocation6], 1 }
 0xfc6   :  { %1909 = vsyncpa [#allocation4], 1 }

</bundles_post_ra>
